<compile_context>
chip_gen: v7x
topology: tpu7x:2x2x1
jax: 0.10.0
libtpu: 0.0.40
codegen_flags: <defaults>
</compile_context>

<pallas_src>
import functools
import math

import numpy as np
import jax
import jax.numpy as jnp
from jax.experimental import pallas as pl
from jax.experimental.pallas import tpu as pltpu

D_MODEL = 256
D_MLP = 128
NUM_HEADS = 4
D_HEAD = D_MODEL // NUM_HEADS
LN_EPS = 1e-5


# ----------------------------- shared helpers ------------------------------

def _layer_norm(x, g, b, eps=LN_EPS):
    mu = jnp.mean(x, axis=-1, keepdims=True)
    var = jnp.mean(jnp.square(x - mu), axis=-1, keepdims=True)
    return (x - mu) * jax.lax.rsqrt(var + eps) * g + b


def _gelu(x):
    c = math.sqrt(2.0 / math.pi)
    return 0.5 * x * (1.0 + jnp.tanh(c * (x + 0.044715 * x * x * x)))


# --------------------------------- kernel ----------------------------------

def mtcma_kernel(q_ref, k_ref, v_ref,
                 w_qkv_ref,   # (3, 256, 256) bf16 : Wq / Wk / Wv
                 w_o_ref,     # (256, 256)    bf16
                 w1_ref,      # (256, 128)    bf16
                 w2_ref,      # (128, 256)    bf16
                 ln_ref,      # (8, 256) f32 : [q_g,q_b,k_g,k_b,v_g,v_b,mlp_g(pad),mlp_b(pad)]
                 bias_ref,    # (6, 256) f32 : [bq,bk,bv,bo,b1(pad),b2]
                 out_ref, *, bt, lq, lk):
    """One batch block (bt elements) per grid step; activations live as 2-D slabs."""
    f32 = jnp.float32
    bf16 = jnp.bfloat16

    # Input LayerNorms on the full (bt*L, 256) slabs (f32 VPU math), single bf16
    # cast per stream feeding the MXU projections.
    qn = _layer_norm(q_ref[...], ln_ref[0:1, :], ln_ref[1:2, :]).astype(bf16)
    kn = _layer_norm(k_ref[...], ln_ref[2:3, :], ln_ref[3:4, :]).astype(bf16)
    vn = _layer_norm(v_ref[...], ln_ref[4:5, :], ln_ref[5:6, :]).astype(bf16)

    # Full-width 256x256 projections: one MXU matmul per stream (full N fills the array).
    Q = jnp.dot(qn, w_qkv_ref[0], preferred_element_type=f32) + bias_ref[0:1, :]
    K = jnp.dot(kn, w_qkv_ref[1], preferred_element_type=f32) + bias_ref[1:2, :]
    V = jnp.dot(vn, w_qkv_ref[2], preferred_element_type=f32) + bias_ref[2:3, :]

    scale = 1.0 / math.sqrt(D_HEAD)
    head_outs = []
    for h in range(NUM_HEADS):                       # static 4-way head loop
        sl = slice(h * D_HEAD, (h + 1) * D_HEAD)
        qh = Q[:, sl].reshape(bt, lq, D_HEAD).astype(bf16)
        kh = K[:, sl].reshape(bt, lk, D_HEAD).astype(bf16)
        vh = V[:, sl].reshape(bt, lk, D_HEAD).astype(bf16)

        s = jnp.einsum('bqd,bkd->bqk', qh, kh, preferred_element_type=f32) * scale
        s = s - jnp.max(s, axis=-1, keepdims=True)
        p = jnp.exp(s)
        p = p * pl.reciprocal(jnp.sum(p, axis=-1, keepdims=True), approx=True)
        oh = jnp.einsum('bqk,bkd->bqd', p.astype(bf16), vh, preferred_element_type=f32)
        head_outs.append(oh.reshape(bt * lq, D_HEAD))

    o_cat = jnp.concatenate(head_outs, axis=-1)      # (bt*lq, 256) lane concat
    x = jnp.dot(o_cat.astype(bf16), w_o_ref[...], preferred_element_type=f32) + bias_ref[3:4, :]

    # MLP residual branch (dropouts are identity in eval mode).
    h1 = jnp.dot(x.astype(bf16), w1_ref[...], preferred_element_type=f32) + bias_ref[4:5, :D_MLP]
    h1 = _layer_norm(_gelu(h1), ln_ref[6:7, :D_MLP], ln_ref[7:8, :D_MLP])
    h2 = jnp.dot(h1.astype(bf16), w2_ref[...], preferred_element_type=f32) + bias_ref[5:6, :]
    h2 = _gelu(h2)

    out_ref[...] = (x + h2).astype(out_ref.dtype)


# --------------------------------- wrapper ---------------------------------

def mtcma_forward(queries, keys, values, packed_params, *, batch_block=None):
    B, Lq, Dq = queries.shape
    Bk, Lk, Dv = keys.shape
    assert Dq == D_MODEL and Dv == D_MODEL and Bk == B and values.shape == keys.shape
    bt = B if batch_block is None else batch_block
    assert B % bt == 0

    # Host-side flatten to lane-dense 2-D slabs (free layout plumbing).
    q2 = queries.reshape(B * Lq, D_MODEL)
    k2 = keys.reshape(B * Lk, D_MODEL)
    v2 = values.reshape(B * Lk, D_MODEL)

    kernel = functools.partial(mtcma_kernel, bt=bt, lq=Lq, lk=Lk)

    in_specs = [
        pl.BlockSpec((bt * Lq, D_MODEL), lambda i: (i, 0)),
        pl.BlockSpec((bt * Lk, D_MODEL), lambda i: (i, 0)),
        pl.BlockSpec((bt * Lk, D_MODEL), lambda i: (i, 0)),
    ]
    for p in packed_params:  # whole (small) packed buffers, resident across all steps
        in_specs.append(pl.BlockSpec(p.shape, lambda i, n=p.ndim: (0,) * n))

    out = pl.pallas_call(
        kernel,
        out_shape=jax.ShapeDtypeStruct((B * Lq, D_MODEL), jnp.float32),
        grid=(B // bt,),
        in_specs=in_specs,
        out_specs=pl.BlockSpec((bt * Lq, D_MODEL), lambda i: (i, 0)),
        compiler_params=pltpu.CompilerParams(
            dimension_semantics=("parallel",)),  # batch blocks shard across v7x's 2 TCs
    )(q2, k2, v2, *packed_params)
    return out.reshape(B, Lq, D_MODEL)


# ----------------------------- parameter setup ------------------------------

def init_raw_params(key):
    """PyTorch-style init of the un-fused MTCMAModelV2 parameters (all f32)."""
    ks = jax.random.split(key, 6)

    def lin(k, din, dout):
        k1, k2 = jax.random.split(k)
        bound = 1.0 / math.sqrt(din)
        w = jax.random.uniform(k1, (din, dout), jnp.float32, -bound, bound)
        b = jax.random.uniform(k2, (dout,), jnp.float32, -bound, bound)
        return w, b

    wq, bq = lin(ks[0], D_MODEL, D_MODEL)
    wk, bk = lin(ks[1], D_MODEL, D_MODEL)
    wv, bv = lin(ks[2], D_MODEL, D_MODEL)
    wo, bo = lin(ks[3], D_MODEL, D_MODEL)
    w1, b1 = lin(ks[4], D_MODEL, D_MLP)
    w2, b2 = lin(ks[5], D_MLP, D_MODEL)
    ones = lambda d: jnp.ones((d,), jnp.float32)
    zeros = lambda d: jnp.zeros((d,), jnp.float32)
    return dict(
        ln_q_g=ones(D_MODEL), ln_q_b=zeros(D_MODEL),
        ln_k_g=ones(D_MODEL), ln_k_b=zeros(D_MODEL),
        ln_v_g=ones(D_MODEL), ln_v_b=zeros(D_MODEL),
        ln_m_g=ones(D_MLP), ln_m_b=zeros(D_MLP),
        wq=wq, bq=bq, wk=wk, bk=bk, wv=wv, bv=bv, wo=wo, bo=bo,
        w1=w1, b1=b1, w2=w2, b2=b2)


def pack_params(p):
    """Host-side exact re-layout of the raw params into 6 kernel buffers.

    Weights that feed the MXU are cast to bf16; biases / LN params stay f32.
    """
    w_qkv = jnp.stack([p["wq"], p["wk"], p["wv"]]).astype(jnp.bfloat16)       # (3, 256, 256)
    w_o = p["wo"].astype(jnp.bfloat16)                                        # (256, 256)
    w1 = p["w1"].astype(jnp.bfloat16)                                         # (256, 128)
    w2 = p["w2"].astype(jnp.bfloat16)                                         # (128, 256)

    pad = lambda v: jnp.pad(v, (0, D_MODEL - v.shape[0]))
    ln_params = jnp.stack([p["ln_q_g"], p["ln_q_b"], p["ln_k_g"], p["ln_k_b"],
                           p["ln_v_g"], p["ln_v_b"],
                           pad(p["ln_m_g"]), pad(p["ln_m_b"])]).astype(jnp.float32)  # (8, 256)
    biases = jnp.stack([p["bq"], p["bk"], p["bv"], p["bo"],
                        pad(p["b1"]), p["b2"]]).astype(jnp.float32)                  # (6, 256)
    return [w_qkv, w_o, w1, w2, ln_params, biases]


# ----------------------------- pure-JAX reference ---------------------------

def reference(queries, keys, values, p):
    qn = _layer_norm(queries, p["ln_q_g"], p["ln_q_b"])
    kn = _layer_norm(keys, p["ln_k_g"], p["ln_k_b"])
    vn = _layer_norm(values, p["ln_v_g"], p["ln_v_b"])

    B, Lq, _ = queries.shape
    Lk = keys.shape[1]
    Q = (qn @ p["wq"] + p["bq"]).reshape(B, Lq, NUM_HEADS, D_HEAD).transpose(0, 2, 1, 3)
    K = (kn @ p["wk"] + p["bk"]).reshape(B, Lk, NUM_HEADS, D_HEAD).transpose(0, 2, 1, 3)
    V = (vn @ p["wv"] + p["bv"]).reshape(B, Lk, NUM_HEADS, D_HEAD).transpose(0, 2, 1, 3)

    s = jnp.einsum("bhqd,bhkd->bhqk", Q, K) / math.sqrt(D_HEAD)
    a = jax.nn.softmax(s, axis=-1)
    o = jnp.einsum("bhqk,bhkd->bhqd", a, V).transpose(0, 2, 1, 3).reshape(B, Lq, D_MODEL)
    x = o @ p["wo"] + p["bo"]

    h1 = _layer_norm(_gelu(x @ p["w1"] + p["b1"]), p["ln_m_g"], p["ln_m_b"])
    h2 = _gelu(h1 @ p["w2"] + p["b2"])
    return x + h2


# ----------------------------------- main -----------------------------------

if __name__ == "__main__":
    # AVModelV2 usage: two MTCMA blocks (a->v and v->a) at dim 256, num_heads=4,
    # each followed by a residual add with its query stream.
    B, La, Lv = 4, 8, 16

    root = jax.random.PRNGKey(0)
    ka, kvv, kp1, kp2 = jax.random.split(root, 4)
    a = jax.random.normal(ka, (B, La, D_MODEL), jnp.float32)   # audio tokens (post-downsampling)
    v = jax.random.normal(kvv, (B, Lv, D_MODEL), jnp.float32)  # video tokens (post-downsampling)

    raw_av = init_raw_params(kp1)
    raw_va = init_raw_params(kp2)
    packed_av = pack_params(raw_av)
    packed_va = pack_params(raw_va)

    av = a + mtcma_forward(a, v, v, packed_av, batch_block=2)   # mtcma_av + residual
    va = v + mtcma_forward(v, a, a, packed_va, batch_block=2)   # mtcma_va + residual
    av, va = jax.block_until_ready((av, va))

    ref_av = a + reference(a, v, v, raw_av)
    ref_va = v + reference(v, a, a, raw_va)
    np.testing.assert_allclose(np.asarray(av), np.asarray(ref_av), rtol=2e-2, atol=2e-2)
    np.testing.assert_allclose(np.asarray(va), np.asarray(ref_va), rtol=2e-2, atol=2e-2)

    assert av.shape == (B, La, D_MODEL) and va.shape == (B, Lv, D_MODEL)
    print("KERNEL_OK")
</pallas_src>

<mosaic_0001>
module attributes {stable_mosaic.version = 11 : i64} {
  func.func @mtcma_kernel(%arg0: i32, %arg1: memref<16x256xf32, #tpu.memory_space<vmem>>, %arg2: memref<32x256xf32, #tpu.memory_space<vmem>>, %arg3: memref<32x256xf32, #tpu.memory_space<vmem>>, %arg4: memref<3x256x256xbf16, #tpu.memory_space<vmem>>, %arg5: memref<256x256xbf16, #tpu.memory_space<vmem>>, %arg6: memref<256x128xbf16, #tpu.memory_space<vmem>>, %arg7: memref<128x256xbf16, #tpu.memory_space<vmem>>, %arg8: memref<8x256xf32, #tpu.memory_space<vmem>>, %arg9: memref<6x256xf32, #tpu.memory_space<vmem>>, %arg10: memref<16x256xf32, #tpu.memory_space<vmem>>) attributes {dimension_semantics = [#tpu.dimension_semantics<parallel>], iteration_bounds = array<i64: 2>, scalar_prefetch = 0 : i64, scratch_operands = 0 : i64, tpu.core_type = #tpu.core_type<tc>, window_params = [{transform_indices = @transform_0, window_bounds = array<i64: 16, 256>}, {transform_indices = @transform_1, window_bounds = array<i64: 32, 256>}, {transform_indices = @transform_2, window_bounds = array<i64: 32, 256>}, {pipeline_mode = #tpu.pipeline_mode<synchronous>, transform_indices = @transform_3, window_bounds = array<i64: 3, 256, 256>}, {pipeline_mode = #tpu.pipeline_mode<synchronous>, transform_indices = @transform_4, window_bounds = array<i64: 256, 256>}, {pipeline_mode = #tpu.pipeline_mode<synchronous>, transform_indices = @transform_5, window_bounds = array<i64: 256, 128>}, {pipeline_mode = #tpu.pipeline_mode<synchronous>, transform_indices = @transform_6, window_bounds = array<i64: 128, 256>}, {pipeline_mode = #tpu.pipeline_mode<synchronous>, transform_indices = @transform_7, window_bounds = array<i64: 8, 256>}, {pipeline_mode = #tpu.pipeline_mode<synchronous>, transform_indices = @transform_8, window_bounds = array<i64: 6, 256>}, {transform_indices = @transform_9, window_bounds = array<i64: 16, 256>}]} {
    %c0 = arith.constant 0 : index
    %c0_0 = arith.constant 0 : index
    %0 = vector.load %arg1[%c0, %c0_0] : memref<16x256xf32, #tpu.memory_space<vmem>>, vector<16x256xf32>
    %c0_1 = arith.constant 0 : index
    %c0_2 = arith.constant 0 : index
    %1 = vector.load %arg8[%c0_1, %c0_2] : memref<8x256xf32, #tpu.memory_space<vmem>>, vector<1x256xf32>
    %c1 = arith.constant 1 : index
    %c0_3 = arith.constant 0 : index
    %2 = vector.load %arg8[%c1, %c0_3] : memref<8x256xf32, #tpu.memory_space<vmem>>, vector<1x256xf32>
    %cst = arith.constant dense<0.000000e+00> : vector<16xf32>
    %3 = vector.multi_reduction <add>, %0, %cst [1] : vector<16x256xf32> to vector<16xf32>
    %4 = vector.shape_cast %3 : vector<16xf32> to vector<16x1xf32>
    %cst_4 = arith.constant 2.560000e+02 : f32
    %5 = vector.broadcast %cst_4 : f32 to vector<16x1xf32>
    %6 = arith.divf %4, %5 : vector<16x1xf32>
    %7 = vector.broadcast %6 : vector<16x1xf32> to vector<16x256xf32>
    %8 = arith.subf %0, %7 : vector<16x256xf32>
    %9 = arith.mulf %8, %8 : vector<16x256xf32>
    %cst_5 = arith.constant dense<0.000000e+00> : vector<16xf32>
    %10 = vector.multi_reduction <add>, %9, %cst_5 [1] : vector<16x256xf32> to vector<16xf32>
    %11 = vector.shape_cast %10 : vector<16xf32> to vector<16x1xf32>
    %cst_6 = arith.constant 2.560000e+02 : f32
    %12 = vector.broadcast %cst_6 : f32 to vector<16x1xf32>
    %13 = arith.divf %11, %12 : vector<16x1xf32>
    %14 = vector.broadcast %6 : vector<16x1xf32> to vector<16x256xf32>
    %15 = arith.subf %0, %14 : vector<16x256xf32>
    %cst_7 = arith.constant 9.99999974E-6 : f32
    %16 = vector.broadcast %cst_7 : f32 to vector<16x1xf32>
    %17 = arith.addf %13, %16 : vector<16x1xf32>
    %18 = math.rsqrt %17 : vector<16x1xf32>
    %19 = vector.broadcast %18 : vector<16x1xf32> to vector<16x256xf32>
    %20 = arith.mulf %15, %19 : vector<16x256xf32>
    %21 = vector.broadcast %1 : vector<1x256xf32> to vector<16x256xf32>
    %22 = arith.mulf %20, %21 : vector<16x256xf32>
    %23 = vector.broadcast %2 : vector<1x256xf32> to vector<16x256xf32>
    %24 = arith.addf %22, %23 : vector<16x256xf32>
    %25 = arith.truncf %24 : vector<16x256xf32> to vector<16x256xbf16>
    %c0_8 = arith.constant 0 : index
    %c0_9 = arith.constant 0 : index
    %26 = vector.load %arg2[%c0_8, %c0_9] : memref<32x256xf32, #tpu.memory_space<vmem>>, vector<32x256xf32>
    %c2 = arith.constant 2 : index
    %c0_10 = arith.constant 0 : index
    %27 = vector.load %arg8[%c2, %c0_10] : memref<8x256xf32, #tpu.memory_space<vmem>>, vector<1x256xf32>
    %c3 = arith.constant 3 : index
    %c0_11 = arith.constant 0 : index
    %28 = vector.load %arg8[%c3, %c0_11] : memref<8x256xf32, #tpu.memory_space<vmem>>, vector<1x256xf32>
    %cst_12 = arith.constant dense<0.000000e+00> : vector<32xf32>
    %29 = vector.multi_reduction <add>, %26, %cst_12 [1] : vector<32x256xf32> to vector<32xf32>
    %30 = vector.shape_cast %29 : vector<32xf32> to vector<32x1xf32>
    %cst_13 = arith.constant 2.560000e+02 : f32
    %31 = vector.broadcast %cst_13 : f32 to vector<32x1xf32>
    %32 = arith.divf %30, %31 : vector<32x1xf32>
    %33 = vector.broadcast %32 : vector<32x1xf32> to vector<32x256xf32>
    %34 = arith.subf %26, %33 : vector<32x256xf32>
    %35 = arith.mulf %34, %34 : vector<32x256xf32>
    %cst_14 = arith.constant dense<0.000000e+00> : vector<32xf32>
    %36 = vector.multi_reduction <add>, %35, %cst_14 [1] : vector<32x256xf32> to vector<32xf32>
    %37 = vector.shape_cast %36 : vector<32xf32> to vector<32x1xf32>
    %cst_15 = arith.constant 2.560000e+02 : f32
    %38 = vector.broadcast %cst_15 : f32 to vector<32x1xf32>
    %39 = arith.divf %37, %38 : vector<32x1xf32>
    %40 = vector.broadcast %32 : vector<32x1xf32> to vector<32x256xf32>
    %41 = arith.subf %26, %40 : vector<32x256xf32>
    %cst_16 = arith.constant 9.99999974E-6 : f32
    %42 = vector.broadcast %cst_16 : f32 to vector<32x1xf32>
    %43 = arith.addf %39, %42 : vector<32x1xf32>
    %44 = math.rsqrt %43 : vector<32x1xf32>
    %45 = vector.broadcast %44 : vector<32x1xf32> to vector<32x256xf32>
    %46 = arith.mulf %41, %45 : vector<32x256xf32>
    %47 = vector.broadcast %27 : vector<1x256xf32> to vector<32x256xf32>
    %48 = arith.mulf %46, %47 : vector<32x256xf32>
    %49 = vector.broadcast %28 : vector<1x256xf32> to vector<32x256xf32>
    %50 = arith.addf %48, %49 : vector<32x256xf32>
    %51 = arith.truncf %50 : vector<32x256xf32> to vector<32x256xbf16>
    %c0_17 = arith.constant 0 : index
    %c0_18 = arith.constant 0 : index
    %52 = vector.load %arg3[%c0_17, %c0_18] : memref<32x256xf32, #tpu.memory_space<vmem>>, vector<32x256xf32>
    %c4 = arith.constant 4 : index
    %c0_19 = arith.constant 0 : index
    %53 = vector.load %arg8[%c4, %c0_19] : memref<8x256xf32, #tpu.memory_space<vmem>>, vector<1x256xf32>
    %c5 = arith.constant 5 : index
    %c0_20 = arith.constant 0 : index
    %54 = vector.load %arg8[%c5, %c0_20] : memref<8x256xf32, #tpu.memory_space<vmem>>, vector<1x256xf32>
    %cst_21 = arith.constant dense<0.000000e+00> : vector<32xf32>
    %55 = vector.multi_reduction <add>, %52, %cst_21 [1] : vector<32x256xf32> to vector<32xf32>
    %56 = vector.shape_cast %55 : vector<32xf32> to vector<32x1xf32>
    %cst_22 = arith.constant 2.560000e+02 : f32
    %57 = vector.broadcast %cst_22 : f32 to vector<32x1xf32>
    %58 = arith.divf %56, %57 : vector<32x1xf32>
    %59 = vector.broadcast %58 : vector<32x1xf32> to vector<32x256xf32>
    %60 = arith.subf %52, %59 : vector<32x256xf32>
    %61 = arith.mulf %60, %60 : vector<32x256xf32>
    %cst_23 = arith.constant dense<0.000000e+00> : vector<32xf32>
    %62 = vector.multi_reduction <add>, %61, %cst_23 [1] : vector<32x256xf32> to vector<32xf32>
    %63 = vector.shape_cast %62 : vector<32xf32> to vector<32x1xf32>
    %cst_24 = arith.constant 2.560000e+02 : f32
    %64 = vector.broadcast %cst_24 : f32 to vector<32x1xf32>
    %65 = arith.divf %63, %64 : vector<32x1xf32>
    %66 = vector.broadcast %58 : vector<32x1xf32> to vector<32x256xf32>
    %67 = arith.subf %52, %66 : vector<32x256xf32>
    %cst_25 = arith.constant 9.99999974E-6 : f32
    %68 = vector.broadcast %cst_25 : f32 to vector<32x1xf32>
    %69 = arith.addf %65, %68 : vector<32x1xf32>
    %70 = math.rsqrt %69 : vector<32x1xf32>
    %71 = vector.broadcast %70 : vector<32x1xf32> to vector<32x256xf32>
    %72 = arith.mulf %67, %71 : vector<32x256xf32>
    %73 = vector.broadcast %53 : vector<1x256xf32> to vector<32x256xf32>
    %74 = arith.mulf %72, %73 : vector<32x256xf32>
    %75 = vector.broadcast %54 : vector<1x256xf32> to vector<32x256xf32>
    %76 = arith.addf %74, %75 : vector<32x256xf32>
    %77 = arith.truncf %76 : vector<32x256xf32> to vector<32x256xbf16>
    %c0_26 = arith.constant 0 : index
    %c0_27 = arith.constant 0 : index
    %c0_28 = arith.constant 0 : index
    %78 = vector.load %arg4[%c0_26, %c0_27, %c0_28] : memref<3x256x256xbf16, #tpu.memory_space<vmem>>, vector<1x256x256xbf16>
    %79 = vector.shape_cast %78 : vector<1x256x256xbf16> to vector<256x256xbf16>
    %cst_29 = arith.constant dense<0.000000e+00> : vector<16x256xf32>
    %80 = tpu.matmul %25, %79, %cst_29 {dimension_numbers = #tpu.dot_dimension_numbers<[1], [0], [0], [1], [0, 0, 1, 1], [], []>} : vector<16x256xbf16>, vector<256x256xbf16>, vector<16x256xf32> -> vector<16x256xf32>
    %c0_30 = arith.constant 0 : index
    %c0_31 = arith.constant 0 : index
    %81 = vector.load %arg9[%c0_30, %c0_31] : memref<6x256xf32, #tpu.memory_space<vmem>>, vector<1x256xf32>
    %82 = vector.broadcast %81 : vector<1x256xf32> to vector<16x256xf32>
    %83 = arith.addf %80, %82 : vector<16x256xf32>
    %c1_32 = arith.constant 1 : index
    %c0_33 = arith.constant 0 : index
    %c0_34 = arith.constant 0 : index
    %84 = vector.load %arg4[%c1_32, %c0_33, %c0_34] : memref<3x256x256xbf16, #tpu.memory_space<vmem>>, vector<1x256x256xbf16>
    %85 = vector.shape_cast %84 : vector<1x256x256xbf16> to vector<256x256xbf16>
    %cst_35 = arith.constant dense<0.000000e+00> : vector<32x256xf32>
    %86 = tpu.matmul %51, %85, %cst_35 {dimension_numbers = #tpu.dot_dimension_numbers<[1], [0], [0], [1], [0, 0, 1, 1], [], []>} : vector<32x256xbf16>, vector<256x256xbf16>, vector<32x256xf32> -> vector<32x256xf32>
    %c1_36 = arith.constant 1 : index
    %c0_37 = arith.constant 0 : index
    %87 = vector.load %arg9[%c1_36, %c0_37] : memref<6x256xf32, #tpu.memory_space<vmem>>, vector<1x256xf32>
    %88 = vector.broadcast %87 : vector<1x256xf32> to vector<32x256xf32>
    %89 = arith.addf %86, %88 : vector<32x256xf32>
    %c2_38 = arith.constant 2 : index
    %c0_39 = arith.constant 0 : index
    %c0_40 = arith.constant 0 : index
    %90 = vector.load %arg4[%c2_38, %c0_39, %c0_40] : memref<3x256x256xbf16, #tpu.memory_space<vmem>>, vector<1x256x256xbf16>
    %91 = vector.shape_cast %90 : vector<1x256x256xbf16> to vector<256x256xbf16>
    %cst_41 = arith.constant dense<0.000000e+00> : vector<32x256xf32>
    %92 = tpu.matmul %77, %91, %cst_41 {dimension_numbers = #tpu.dot_dimension_numbers<[1], [0], [0], [1], [0, 0, 1, 1], [], []>} : vector<32x256xbf16>, vector<256x256xbf16>, vector<32x256xf32> -> vector<32x256xf32>
    %c2_42 = arith.constant 2 : index
    %c0_43 = arith.constant 0 : index
    %93 = vector.load %arg9[%c2_42, %c0_43] : memref<6x256xf32, #tpu.memory_space<vmem>>, vector<1x256xf32>
    %94 = vector.broadcast %93 : vector<1x256xf32> to vector<32x256xf32>
    %95 = arith.addf %92, %94 : vector<32x256xf32>
    %96 = vector.extract_strided_slice %83 {offsets = [0, 0], sizes = [16, 64], strides = [1, 1]} : vector<16x256xf32> to vector<16x64xf32>
    %97 = vector.shape_cast %96 : vector<16x64xf32> to vector<2x8x64xf32>
    %98 = arith.truncf %97 : vector<2x8x64xf32> to vector<2x8x64xbf16>
    %99 = vector.extract_strided_slice %89 {offsets = [0, 0], sizes = [32, 64], strides = [1, 1]} : vector<32x256xf32> to vector<32x64xf32>
    %100 = vector.shape_cast %99 : vector<32x64xf32> to vector<2x16x64xf32>
    %101 = arith.truncf %100 : vector<2x16x64xf32> to vector<2x16x64xbf16>
    %102 = vector.extract_strided_slice %95 {offsets = [0, 0], sizes = [32, 64], strides = [1, 1]} : vector<32x256xf32> to vector<32x64xf32>
    %103 = vector.shape_cast %102 : vector<32x64xf32> to vector<2x16x64xf32>
    %104 = arith.truncf %103 : vector<2x16x64xf32> to vector<2x16x64xbf16>
    "tpu.trace_start"() <{level = 10 : i32, message = "bqd,bkd->bqk"}> : () -> ()
    %cst_44 = arith.constant dense<0.000000e+00> : vector<2x8x16xf32>
    %105 = tpu.matmul %98, %101, %cst_44 {dimension_numbers = #tpu.dot_dimension_numbers<[2], [2], [1], [1], [0, 0, 0, 1, 1, 1], [0], [0]>} : vector<2x8x64xbf16>, vector<2x16x64xbf16>, vector<2x8x16xf32> -> vector<2x8x16xf32>
    "tpu.trace_stop"() : () -> ()
    %cst_45 = arith.constant 1.250000e-01 : f32
    %106 = vector.broadcast %cst_45 : f32 to vector<2x8x16xf32>
    %107 = arith.mulf %105, %106 : vector<2x8x16xf32>
    %cst_46 = arith.constant dense<0xFF800000> : vector<2x8xf32>
    %108 = vector.multi_reduction <maximumf>, %107, %cst_46 [2] : vector<2x8x16xf32> to vector<2x8xf32>
    %109 = vector.shape_cast %108 : vector<2x8xf32> to vector<2x8x1xf32>
    %110 = vector.broadcast %109 : vector<2x8x1xf32> to vector<2x8x16xf32>
    %111 = arith.subf %107, %110 : vector<2x8x16xf32>
    %112 = math.exp %111 : vector<2x8x16xf32>
    %cst_47 = arith.constant dense<0.000000e+00> : vector<2x8xf32>
    %113 = vector.multi_reduction <add>, %112, %cst_47 [2] : vector<2x8x16xf32> to vector<2x8xf32>
    %114 = vector.shape_cast %113 : vector<2x8xf32> to vector<2x8x1xf32>
    %115 = tpu.reciprocal %114 {approx = true} : vector<2x8x1xf32> -> vector<2x8x1xf32>
    %116 = vector.broadcast %115 : vector<2x8x1xf32> to vector<2x8x16xf32>
    %117 = arith.mulf %112, %116 : vector<2x8x16xf32>
    %118 = arith.truncf %117 : vector<2x8x16xf32> to vector<2x8x16xbf16>
    "tpu.trace_start"() <{level = 10 : i32, message = "bqk,bkd->bqd"}> : () -> ()
    %cst_48 = arith.constant dense<0.000000e+00> : vector<2x8x64xf32>
    %119 = tpu.matmul %118, %104, %cst_48 {dimension_numbers = #tpu.dot_dimension_numbers<[2], [1], [1], [2], [0, 0, 0, 1, 1, 2], [0], [0]>} : vector<2x8x16xbf16>, vector<2x16x64xbf16>, vector<2x8x64xf32> -> vector<2x8x64xf32>
    "tpu.trace_stop"() : () -> ()
    %120 = vector.shape_cast %119 : vector<2x8x64xf32> to vector<16x64xf32>
    %121 = vector.extract_strided_slice %83 {offsets = [0, 64], sizes = [16, 64], strides = [1, 1]} : vector<16x256xf32> to vector<16x64xf32>
    %122 = vector.shape_cast %121 : vector<16x64xf32> to vector<2x8x64xf32>
    %123 = arith.truncf %122 : vector<2x8x64xf32> to vector<2x8x64xbf16>
    %124 = vector.extract_strided_slice %89 {offsets = [0, 64], sizes = [32, 64], strides = [1, 1]} : vector<32x256xf32> to vector<32x64xf32>
    %125 = vector.shape_cast %124 : vector<32x64xf32> to vector<2x16x64xf32>
    %126 = arith.truncf %125 : vector<2x16x64xf32> to vector<2x16x64xbf16>
    %127 = vector.extract_strided_slice %95 {offsets = [0, 64], sizes = [32, 64], strides = [1, 1]} : vector<32x256xf32> to vector<32x64xf32>
    %128 = vector.shape_cast %127 : vector<32x64xf32> to vector<2x16x64xf32>
    %129 = arith.truncf %128 : vector<2x16x64xf32> to vector<2x16x64xbf16>
    "tpu.trace_start"() <{level = 10 : i32, message = "bqd,bkd->bqk"}> : () -> ()
    %cst_49 = arith.constant dense<0.000000e+00> : vector<2x8x16xf32>
    %130 = tpu.matmul %123, %126, %cst_49 {dimension_numbers = #tpu.dot_dimension_numbers<[2], [2], [1], [1], [0, 0, 0, 1, 1, 1], [0], [0]>} : vector<2x8x64xbf16>, vector<2x16x64xbf16>, vector<2x8x16xf32> -> vector<2x8x16xf32>
    "tpu.trace_stop"() : () -> ()
    %cst_50 = arith.constant 1.250000e-01 : f32
    %131 = vector.broadcast %cst_50 : f32 to vector<2x8x16xf32>
    %132 = arith.mulf %130, %131 : vector<2x8x16xf32>
    %cst_51 = arith.constant dense<0xFF800000> : vector<2x8xf32>
    %133 = vector.multi_reduction <maximumf>, %132, %cst_51 [2] : vector<2x8x16xf32> to vector<2x8xf32>
    %134 = vector.shape_cast %133 : vector<2x8xf32> to vector<2x8x1xf32>
    %135 = vector.broadcast %134 : vector<2x8x1xf32> to vector<2x8x16xf32>
    %136 = arith.subf %132, %135 : vector<2x8x16xf32>
    %137 = math.exp %136 : vector<2x8x16xf32>
    %cst_52 = arith.constant dense<0.000000e+00> : vector<2x8xf32>
    %138 = vector.multi_reduction <add>, %137, %cst_52 [2] : vector<2x8x16xf32> to vector<2x8xf32>
    %139 = vector.shape_cast %138 : vector<2x8xf32> to vector<2x8x1xf32>
    %140 = tpu.reciprocal %139 {approx = true} : vector<2x8x1xf32> -> vector<2x8x1xf32>
    %141 = vector.broadcast %140 : vector<2x8x1xf32> to vector<2x8x16xf32>
    %142 = arith.mulf %137, %141 : vector<2x8x16xf32>
    %143 = arith.truncf %142 : vector<2x8x16xf32> to vector<2x8x16xbf16>
    "tpu.trace_start"() <{level = 10 : i32, message = "bqk,bkd->bqd"}> : () -> ()
    %cst_53 = arith.constant dense<0.000000e+00> : vector<2x8x64xf32>
    %144 = tpu.matmul %143, %129, %cst_53 {dimension_numbers = #tpu.dot_dimension_numbers<[2], [1], [1], [2], [0, 0, 0, 1, 1, 2], [0], [0]>} : vector<2x8x16xbf16>, vector<2x16x64xbf16>, vector<2x8x64xf32> -> vector<2x8x64xf32>
    "tpu.trace_stop"() : () -> ()
    %145 = vector.shape_cast %144 : vector<2x8x64xf32> to vector<16x64xf32>
    %146 = vector.extract_strided_slice %83 {offsets = [0, 128], sizes = [16, 64], strides = [1, 1]} : vector<16x256xf32> to vector<16x64xf32>
    %147 = vector.shape_cast %146 : vector<16x64xf32> to vector<2x8x64xf32>
    %148 = arith.truncf %147 : vector<2x8x64xf32> to vector<2x8x64xbf16>
    %149 = vector.extract_strided_slice %89 {offsets = [0, 128], sizes = [32, 64], strides = [1, 1]} : vector<32x256xf32> to vector<32x64xf32>
    %150 = vector.shape_cast %149 : vector<32x64xf32> to vector<2x16x64xf32>
    %151 = arith.truncf %150 : vector<2x16x64xf32> to vector<2x16x64xbf16>
    %152 = vector.extract_strided_slice %95 {offsets = [0, 128], sizes = [32, 64], strides = [1, 1]} : vector<32x256xf32> to vector<32x64xf32>
    %153 = vector.shape_cast %152 : vector<32x64xf32> to vector<2x16x64xf32>
    %154 = arith.truncf %153 : vector<2x16x64xf32> to vector<2x16x64xbf16>
    "tpu.trace_start"() <{level = 10 : i32, message = "bqd,bkd->bqk"}> : () -> ()
    %cst_54 = arith.constant dense<0.000000e+00> : vector<2x8x16xf32>
    %155 = tpu.matmul %148, %151, %cst_54 {dimension_numbers = #tpu.dot_dimension_numbers<[2], [2], [1], [1], [0, 0, 0, 1, 1, 1], [0], [0]>} : vector<2x8x64xbf16>, vector<2x16x64xbf16>, vector<2x8x16xf32> -> vector<2x8x16xf32>
    "tpu.trace_stop"() : () -> ()
    %cst_55 = arith.constant 1.250000e-01 : f32
    %156 = vector.broadcast %cst_55 : f32 to vector<2x8x16xf32>
    %157 = arith.mulf %155, %156 : vector<2x8x16xf32>
    %cst_56 = arith.constant dense<0xFF800000> : vector<2x8xf32>
    %158 = vector.multi_reduction <maximumf>, %157, %cst_56 [2] : vector<2x8x16xf32> to vector<2x8xf32>
    %159 = vector.shape_cast %158 : vector<2x8xf32> to vector<2x8x1xf32>
    %160 = vector.broadcast %159 : vector<2x8x1xf32> to vector<2x8x16xf32>
    %161 = arith.subf %157, %160 : vector<2x8x16xf32>
    %162 = math.exp %161 : vector<2x8x16xf32>
    %cst_57 = arith.constant dense<0.000000e+00> : vector<2x8xf32>
    %163 = vector.multi_reduction <add>, %162, %cst_57 [2] : vector<2x8x16xf32> to vector<2x8xf32>
    %164 = vector.shape_cast %163 : vector<2x8xf32> to vector<2x8x1xf32>
    %165 = tpu.reciprocal %164 {approx = true} : vector<2x8x1xf32> -> vector<2x8x1xf32>
    %166 = vector.broadcast %165 : vector<2x8x1xf32> to vector<2x8x16xf32>
    %167 = arith.mulf %162, %166 : vector<2x8x16xf32>
    %168 = arith.truncf %167 : vector<2x8x16xf32> to vector<2x8x16xbf16>
    "tpu.trace_start"() <{level = 10 : i32, message = "bqk,bkd->bqd"}> : () -> ()
    %cst_58 = arith.constant dense<0.000000e+00> : vector<2x8x64xf32>
    %169 = tpu.matmul %168, %154, %cst_58 {dimension_numbers = #tpu.dot_dimension_numbers<[2], [1], [1], [2], [0, 0, 0, 1, 1, 2], [0], [0]>} : vector<2x8x16xbf16>, vector<2x16x64xbf16>, vector<2x8x64xf32> -> vector<2x8x64xf32>
    "tpu.trace_stop"() : () -> ()
    %170 = vector.shape_cast %169 : vector<2x8x64xf32> to vector<16x64xf32>
    %171 = vector.extract_strided_slice %83 {offsets = [0, 192], sizes = [16, 64], strides = [1, 1]} : vector<16x256xf32> to vector<16x64xf32>
    %172 = vector.shape_cast %171 : vector<16x64xf32> to vector<2x8x64xf32>
    %173 = arith.truncf %172 : vector<2x8x64xf32> to vector<2x8x64xbf16>
    %174 = vector.extract_strided_slice %89 {offsets = [0, 192], sizes = [32, 64], strides = [1, 1]} : vector<32x256xf32> to vector<32x64xf32>
    %175 = vector.shape_cast %174 : vector<32x64xf32> to vector<2x16x64xf32>
    %176 = arith.truncf %175 : vector<2x16x64xf32> to vector<2x16x64xbf16>
    %177 = vector.extract_strided_slice %95 {offsets = [0, 192], sizes = [32, 64], strides = [1, 1]} : vector<32x256xf32> to vector<32x64xf32>
    %178 = vector.shape_cast %177 : vector<32x64xf32> to vector<2x16x64xf32>
    %179 = arith.truncf %178 : vector<2x16x64xf32> to vector<2x16x64xbf16>
    "tpu.trace_start"() <{level = 10 : i32, message = "bqd,bkd->bqk"}> : () -> ()
    %cst_59 = arith.constant dense<0.000000e+00> : vector<2x8x16xf32>
    %180 = tpu.matmul %173, %176, %cst_59 {dimension_numbers = #tpu.dot_dimension_numbers<[2], [2], [1], [1], [0, 0, 0, 1, 1, 1], [0], [0]>} : vector<2x8x64xbf16>, vector<2x16x64xbf16>, vector<2x8x16xf32> -> vector<2x8x16xf32>
    "tpu.trace_stop"() : () -> ()
    %cst_60 = arith.constant 1.250000e-01 : f32
    %181 = vector.broadcast %cst_60 : f32 to vector<2x8x16xf32>
    %182 = arith.mulf %180, %181 : vector<2x8x16xf32>
    %cst_61 = arith.constant dense<0xFF800000> : vector<2x8xf32>
    %183 = vector.multi_reduction <maximumf>, %182, %cst_61 [2] : vector<2x8x16xf32> to vector<2x8xf32>
    %184 = vector.shape_cast %183 : vector<2x8xf32> to vector<2x8x1xf32>
    %185 = vector.broadcast %184 : vector<2x8x1xf32> to vector<2x8x16xf32>
    %186 = arith.subf %182, %185 : vector<2x8x16xf32>
    %187 = math.exp %186 : vector<2x8x16xf32>
    %cst_62 = arith.constant dense<0.000000e+00> : vector<2x8xf32>
    %188 = vector.multi_reduction <add>, %187, %cst_62 [2] : vector<2x8x16xf32> to vector<2x8xf32>
    %189 = vector.shape_cast %188 : vector<2x8xf32> to vector<2x8x1xf32>
    %190 = tpu.reciprocal %189 {approx = true} : vector<2x8x1xf32> -> vector<2x8x1xf32>
    %191 = vector.broadcast %190 : vector<2x8x1xf32> to vector<2x8x16xf32>
    %192 = arith.mulf %187, %191 : vector<2x8x16xf32>
    %193 = arith.truncf %192 : vector<2x8x16xf32> to vector<2x8x16xbf16>
    "tpu.trace_start"() <{level = 10 : i32, message = "bqk,bkd->bqd"}> : () -> ()
    %cst_63 = arith.constant dense<0.000000e+00> : vector<2x8x64xf32>
    %194 = tpu.matmul %193, %179, %cst_63 {dimension_numbers = #tpu.dot_dimension_numbers<[2], [1], [1], [2], [0, 0, 0, 1, 1, 2], [0], [0]>} : vector<2x8x16xbf16>, vector<2x16x64xbf16>, vector<2x8x64xf32> -> vector<2x8x64xf32>
    "tpu.trace_stop"() : () -> ()
    %195 = vector.shape_cast %194 : vector<2x8x64xf32> to vector<16x64xf32>
    %196 = tpu.concatenate %120, %145, %170, %195 in 1 : vector<16x64xf32>, vector<16x64xf32>, vector<16x64xf32>, vector<16x64xf32> -> vector<16x256xf32>
    %197 = arith.truncf %196 : vector<16x256xf32> to vector<16x256xbf16>
    %c0_64 = arith.constant 0 : index
    %c0_65 = arith.constant 0 : index
    %198 = vector.load %arg5[%c0_64, %c0_65] : memref<256x256xbf16, #tpu.memory_space<vmem>>, vector<256x256xbf16>
    %cst_66 = arith.constant dense<0.000000e+00> : vector<16x256xf32>
    %199 = tpu.matmul %197, %198, %cst_66 {dimension_numbers = #tpu.dot_dimension_numbers<[1], [0], [0], [1], [0, 0, 1, 1], [], []>} : vector<16x256xbf16>, vector<256x256xbf16>, vector<16x256xf32> -> vector<16x256xf32>
    %c3_67 = arith.constant 3 : index
    %c0_68 = arith.constant 0 : index
    %200 = vector.load %arg9[%c3_67, %c0_68] : memref<6x256xf32, #tpu.memory_space<vmem>>, vector<1x256xf32>
    %201 = vector.broadcast %200 : vector<1x256xf32> to vector<16x256xf32>
    %202 = arith.addf %199, %201 : vector<16x256xf32>
    %203 = arith.truncf %202 : vector<16x256xf32> to vector<16x256xbf16>
    %c0_69 = arith.constant 0 : index
    %c0_70 = arith.constant 0 : index
    %204 = vector.load %arg6[%c0_69, %c0_70] : memref<256x128xbf16, #tpu.memory_space<vmem>>, vector<256x128xbf16>
    %cst_71 = arith.constant dense<0.000000e+00> : vector<16x128xf32>
    %205 = tpu.matmul %203, %204, %cst_71 {dimension_numbers = #tpu.dot_dimension_numbers<[1], [0], [0], [1], [0, 0, 1, 1], [], []>} : vector<16x256xbf16>, vector<256x128xbf16>, vector<16x128xf32> -> vector<16x128xf32>
    %c4_72 = arith.constant 4 : index
    %c0_73 = arith.constant 0 : index
    %206 = vector.load %arg9[%c4_72, %c0_73] : memref<6x256xf32, #tpu.memory_space<vmem>>, vector<1x128xf32>
    %207 = vector.broadcast %206 : vector<1x128xf32> to vector<16x128xf32>
    %208 = arith.addf %205, %207 : vector<16x128xf32>
    %cst_74 = arith.constant 5.000000e-01 : f32
    %209 = vector.broadcast %cst_74 : f32 to vector<16x128xf32>
    %210 = arith.mulf %209, %208 : vector<16x128xf32>
    %cst_75 = arith.constant 4.471500e-02 : f32
    %211 = vector.broadcast %cst_75 : f32 to vector<16x128xf32>
    %212 = arith.mulf %211, %208 : vector<16x128xf32>
    %213 = arith.mulf %212, %208 : vector<16x128xf32>
    %214 = arith.mulf %213, %208 : vector<16x128xf32>
    %215 = arith.addf %208, %214 : vector<16x128xf32>
    %cst_76 = arith.constant 0.797884583 : f32
    %216 = vector.broadcast %cst_76 : f32 to vector<16x128xf32>
    %217 = arith.mulf %216, %215 : vector<16x128xf32>
    %218 = math.tanh %217 : vector<16x128xf32>
    %cst_77 = arith.constant 1.000000e+00 : f32
    %219 = vector.broadcast %cst_77 : f32 to vector<16x128xf32>
    %220 = arith.addf %219, %218 : vector<16x128xf32>
    %221 = arith.mulf %210, %220 : vector<16x128xf32>
    %c6 = arith.constant 6 : index
    %c0_78 = arith.constant 0 : index
    %222 = vector.load %arg8[%c6, %c0_78] : memref<8x256xf32, #tpu.memory_space<vmem>>, vector<1x128xf32>
    %c7 = arith.constant 7 : index
    %c0_79 = arith.constant 0 : index
    %223 = vector.load %arg8[%c7, %c0_79] : memref<8x256xf32, #tpu.memory_space<vmem>>, vector<1x128xf32>
    %cst_80 = arith.constant dense<0.000000e+00> : vector<16xf32>
    %224 = vector.multi_reduction <add>, %221, %cst_80 [1] : vector<16x128xf32> to vector<16xf32>
    %225 = vector.shape_cast %224 : vector<16xf32> to vector<16x1xf32>
    %cst_81 = arith.constant 1.280000e+02 : f32
    %226 = vector.broadcast %cst_81 : f32 to vector<16x1xf32>
    %227 = arith.divf %225, %226 : vector<16x1xf32>
    %228 = vector.broadcast %227 : vector<16x1xf32> to vector<16x128xf32>
    %229 = arith.subf %221, %228 : vector<16x128xf32>
    %230 = arith.mulf %229, %229 : vector<16x128xf32>
    %cst_82 = arith.constant dense<0.000000e+00> : vector<16xf32>
    %231 = vector.multi_reduction <add>, %230, %cst_82 [1] : vector<16x128xf32> to vector<16xf32>
    %232 = vector.shape_cast %231 : vector<16xf32> to vector<16x1xf32>
    %cst_83 = arith.constant 1.280000e+02 : f32
    %233 = vector.broadcast %cst_83 : f32 to vector<16x1xf32>
    %234 = arith.divf %232, %233 : vector<16x1xf32>
    %235 = vector.broadcast %227 : vector<16x1xf32> to vector<16x128xf32>
    %236 = arith.subf %221, %235 : vector<16x128xf32>
    %cst_84 = arith.constant 9.99999974E-6 : f32
    %237 = vector.broadcast %cst_84 : f32 to vector<16x1xf32>
    %238 = arith.addf %234, %237 : vector<16x1xf32>
    %239 = math.rsqrt %238 : vector<16x1xf32>
    %240 = vector.broadcast %239 : vector<16x1xf32> to vector<16x128xf32>
    %241 = arith.mulf %236, %240 : vector<16x128xf32>
    %242 = vector.broadcast %222 : vector<1x128xf32> to vector<16x128xf32>
    %243 = arith.mulf %241, %242 : vector<16x128xf32>
    %244 = vector.broadcast %223 : vector<1x128xf32> to vector<16x128xf32>
    %245 = arith.addf %243, %244 : vector<16x128xf32>
    %246 = arith.truncf %245 : vector<16x128xf32> to vector<16x128xbf16>
    %c0_85 = arith.constant 0 : index
    %c0_86 = arith.constant 0 : index
    %247 = vector.load %arg7[%c0_85, %c0_86] : memref<128x256xbf16, #tpu.memory_space<vmem>>, vector<128x256xbf16>
    %cst_87 = arith.constant dense<0.000000e+00> : vector<16x256xf32>
    %248 = tpu.matmul %246, %247, %cst_87 {dimension_numbers = #tpu.dot_dimension_numbers<[1], [0], [0], [1], [0, 0, 1, 1], [], []>} : vector<16x128xbf16>, vector<128x256xbf16>, vector<16x256xf32> -> vector<16x256xf32>
    %c5_88 = arith.constant 5 : index
    %c0_89 = arith.constant 0 : index
    %249 = vector.load %arg9[%c5_88, %c0_89] : memref<6x256xf32, #tpu.memory_space<vmem>>, vector<1x256xf32>
    %250 = vector.broadcast %249 : vector<1x256xf32> to vector<16x256xf32>
    %251 = arith.addf %248, %250 : vector<16x256xf32>
    %cst_90 = arith.constant 5.000000e-01 : f32
    %252 = vector.broadcast %cst_90 : f32 to vector<16x256xf32>
    %253 = arith.mulf %252, %251 : vector<16x256xf32>
    %cst_91 = arith.constant 4.471500e-02 : f32
    %254 = vector.broadcast %cst_91 : f32 to vector<16x256xf32>
    %255 = arith.mulf %254, %251 : vector<16x256xf32>
    %256 = arith.mulf %255, %251 : vector<16x256xf32>
    %257 = arith.mulf %256, %251 : vector<16x256xf32>
    %258 = arith.addf %251, %257 : vector<16x256xf32>
    %cst_92 = arith.constant 0.797884583 : f32
    %259 = vector.broadcast %cst_92 : f32 to vector<16x256xf32>
    %260 = arith.mulf %259, %258 : vector<16x256xf32>
    %261 = math.tanh %260 : vector<16x256xf32>
    %cst_93 = arith.constant 1.000000e+00 : f32
    %262 = vector.broadcast %cst_93 : f32 to vector<16x256xf32>
    %263 = arith.addf %262, %261 : vector<16x256xf32>
    %264 = arith.mulf %253, %263 : vector<16x256xf32>
    %265 = arith.addf %202, %264 : vector<16x256xf32>
    %c0_94 = arith.constant 0 : index
    %c0_95 = arith.constant 0 : index
    %266 = vector.load %arg10[%c0_94, %c0_95] : memref<16x256xf32, #tpu.memory_space<vmem>>, vector<16x256xf32>
    tpu.vector_store %arg10[%c0_94, %c0_95], %265 {strides = array<i32>} : memref<16x256xf32, #tpu.memory_space<vmem>>, vector<16x256xf32>,
    return
  }
  func.func @transform_0(%arg0: i32) -> (i32, i32) {
    %c0_i32 = arith.constant 0 : i32
    %c0_i32_0 = arith.constant 0 : i32
    return %arg0, %c0_i32 : i32, i32
  }
  func.func @transform_1(%arg0: i32) -> (i32, i32) {
    %c0_i32 = arith.constant 0 : i32
    %c0_i32_0 = arith.constant 0 : i32
    return %arg0, %c0_i32 : i32, i32
  }
  func.func @transform_2(%arg0: i32) -> (i32, i32) {
    %c0_i32 = arith.constant 0 : i32
    %c0_i32_0 = arith.constant 0 : i32
    return %arg0, %c0_i32 : i32, i32
  }
  func.func @transform_3(%arg0: i32) -> (i32, i32, i32) {
    %c0_i32 = arith.constant 0 : i32
    %c0_i32_0 = arith.constant 0 : i32
    %c0_i32_1 = arith.constant 0 : i32
    %c0_i32_2 = arith.constant 0 : i32
    return %c0_i32, %c0_i32_0, %c0_i32_1 : i32, i32, i32
  }
  func.func @transform_4(%arg0: i32) -> (i32, i32) {
    %c0_i32 = arith.constant 0 : i32
    %c0_i32_0 = arith.constant 0 : i32
    %c0_i32_1 = arith.constant 0 : i32
    return %c0_i32, %c0_i32_0 : i32, i32
  }
  func.func @transform_5(%arg0: i32) -> (i32, i32) {
    %c0_i32 = arith.constant 0 : i32
    %c0_i32_0 = arith.constant 0 : i32
    %c0_i32_1 = arith.constant 0 : i32
    return %c0_i32, %c0_i32_0 : i32, i32
  }
  func.func @transform_6(%arg0: i32) -> (i32, i32) {
    %c0_i32 = arith.constant 0 : i32
    %c0_i32_0 = arith.constant 0 : i32
    %c0_i32_1 = arith.constant 0 : i32
    return %c0_i32, %c0_i32_0 : i32, i32
  }
  func.func @transform_7(%arg0: i32) -> (i32, i32) {
    %c0_i32 = arith.constant 0 : i32
    %c0_i32_0 = arith.constant 0 : i32
    %c0_i32_1 = arith.constant 0 : i32
    return %c0_i32, %c0_i32_0 : i32, i32
  }
  func.func @transform_8(%arg0: i32) -> (i32, i32) {
    %c0_i32 = arith.constant 0 : i32
    %c0_i32_0 = arith.constant 0 : i32
    %c0_i32_1 = arith.constant 0 : i32
    return %c0_i32, %c0_i32_0 : i32, i32
  }
  func.func @transform_9(%arg0: i32) -> (i32, i32) {
    %c0_i32 = arith.constant 0 : i32
    %c0_i32_0 = arith.constant 0 : i32
    return %arg0, %c0_i32 : i32, i32
  }
}

</mosaic_0001>

<bundles_post_ra>
// kernel: tpu_custom_call.1
= control target key start
LH: loop header
LB: loop body
LE: loop exit
PB: predicated region body
PF: predicated region fallthrough
CT: control target
= control target key end

     0   :  { %s5361_s0 = inlined_call_operand.hbm [shape: f32[32,256], index: 0, kind: input, shape index: {}]   ;;  %s5362_s1 = inlined_call_operand.hbm [shape: f32[64,256], index: 1, kind: input, shape index: {}]   ;;  %s5363_s2 = inlined_call_operand.hbm [shape: f32[64,256], index: 2, kind: input, shape index: {}]   ;;  %s5364_s3 = inlined_call_operand.hbm [shape: bf16[3,256,256], index: 3, kind: input, shape index: {}]   ;;  %s5365_s4 = inlined_call_operand.hbm [shape: bf16[256,256], index: 4, kind: input, shape index: {}]   ;;  %s5366_s5 = inlined_call_operand.hbm [shape: bf16[256,128], index: 5, kind: input, shape index: {}]   ;;  %s5367_s6 = inlined_call_operand.hbm [shape: bf16[128,256], index: 6, kind: input, shape index: {}]   ;;  %s5368_s7 = inlined_call_operand.vmem [shape: f32[8,256], index: 7, kind: input, shape index: {}]   ;;  %s5369_s8 = inlined_call_operand.hbm [shape: f32[6,256], index: 8, kind: input, shape index: {}]   ;;  %s5370_s9 = inlined_call_operand.hbm [shape: f32[32,256], index: 9, kind: output, shape index: {}]  }
   0x1   :  { %5406 = sst [smem:[#allocation31_spill]] %s5362_s1 }
   0x2   :  { %5407 = sst [smem:[#allocation32_spill]] %s5364_s3 }
   0x3   :  { %5408 = sst [smem:[#allocation33_spill]] %s5366_s5 }
   0x4   :  { %5409 = sst [smem:[#allocation34_spill]] %s5368_s7 }
   0x5   :  { %5410 = sst [smem:[#allocation35_spill]] %s5370_s9 }
   0x6   :  { %14 = vsyncpa [#allocation3], 0 }
   0x7   :  { %16 = vsyncpa [#allocation3 + $0x1], 0 }
   0x8   :  { %17 = vsyncpa [#allocation6], 0 }
   0x9   :  { %19 = vsyncpa [#allocation6 + $0x1], 0 }
   0xa   :  { %20 = vsyncpa [#allocation9], 0 }
   0xb   :  { %21 = vsyncpa [#allocation12], 0 }
   0xc   :  { %22 = vsyncpa [#allocation15], 0 }
   0xd   :  { %23 = vsyncpa [#allocation4], 0 }
   0xe   :  { %25 = vsyncpa [#allocation4 + $0x1], 0  ;;  %s4504_s30 = smov 0   ;;  %s4506_s10 = smov 0  }
   0xf   :  { %s4508_s11 = smov 0   ;;  %s4510_s12 = smov 0  }
  0x10 LB: > { %5411 = sst [smem:[#allocation23_spill]] %s4419_s30  ;;  %s4433_s13 = smov [#allocation8]   ;;  %s4431_s12 = sphi %s4510_s12, %s5460_s12   ;;  %s4427_s11 = sphi %s4508_s11, %s5462_s11   ;;  %s4423_s10 = sphi %s4506_s10, %s5464_s10   ;;  %s4419_s30 = sphi %s4504_s30, %s5463_s30  }
  0x11   : > { %5412 = sst [smem:[#allocation24_spill]] %s4427_s11  ;;  %s278_s14 = sshll.u32 %s4433_s13, 4  ;;  %s4531_s14 = int_to_ptr.vmem [resolvable:$true] %s278_s14 }
  0x12   : > { %s4525_s15 = sadd.s32 4294967295, %s4431_s12   ;;  %p3316_p0 = scmp.ge.s32.totalorder %s4431_s12, 1 }
  0x13   : > { %5413 = sst [smem:[#allocation25_spill]] %s4525_s15  ;;  %p5371_p1 = scmp.eq.s32.totalorder %s4525_s15, 0 }
  0x14   : > { %p253_p2 = scmp.eq.s32.totalorder %s4525_s15, 1  ;;  %p266_p3 = scmp.lt.s32.totalorder %s4431_s12, 3 }
  0x15   : > { %s4434_s17 = smov [#allocation11]   ;;  %s5416_s3 = sld [smem:[#allocation32_spill]] }
  0x16   : > { %p4533_p4 = pnand %p3316_p0, %p266_p3  ;;  %s304_s18 = sshll.u32 %s4434_s17, 4  ;;  %s4540_s18 = int_to_ptr.vmem [resolvable:$true] %s304_s18 }
  0x18   : > { %s5414_s16 = scalar_select %p4533_p4, 1, 0 }
  0x19   : > { %p3718_p6 = pneg %p4533_p4 }
  0x1b   : > { %p4544_p7 = pnand %p3718_p6, %p5371_p1  ;;  %s4119_s22 = scalar_lea.hbm %s5416_s3, 12288 }
  0x1c   : > { %p4120_p8 = scmp.ne.s32.totalorder %s5416_s3, %s4119_s22  ;;  %p4126_p12 = scmp.lt.u32.totalorder %s4119_s22, %s5416_s3 }
  0x1d   : > { %s5415_s19 = scalar_select %p4544_p7, 1, 0 }
  0x1e   : > { %p4556_p9 = pneg %p4544_p7 }
  0x20   : > { %s5417_s25 = scalar_select %p4556_p9, 1, 0 }
  0x21   : > { %p4122_p10 = pnand %p4556_p9, %p4120_p8 }
  0x23   : > { %p4123_p11 = pneg %p4122_p10 }
  0x25   : > { %p4128_p13 = pnand %p4126_p12, %p4123_p11 }
  0x27   : > { %4131 = shalt.err (!%p4128_p13)
}
  0x28   : > { %s4132_s28 = scalar_lea.vmem %s4531_s14, 12288  ;;  %p4140_p5 = scmp.lt.s32.totalorder %s4531_s14, %s4531_s14 }
  0x29   : > { %p4133_p0 = scmp.ne.s32.totalorder %s4531_s14, %s4132_s28  ;;  %p4141_p1 = scmp.lt.s32.totalorder %s4132_s28, %s4132_s28 }
  0x2b   : > { %p4135_p3 = pnand %p4133_p0, %p4556_p9  ;;  %p4142_p8 = por %p4141_p1, %p4140_p5 }
  0x2d   : > { %p4136_p6 = pneg %p4135_p3 }
  0x2f   : > { %p4143_p10 = pnand %p4142_p8, %p4136_p6 }
  0x31   : > { %4146 = shalt.err (!%p4143_p10)
}
  0x32   : > { %s5373_s29 = smov 128   ;;  %s5375_s13 = smov 8  }
  0x33   : > { %3721 = dma.hbm_to_vmem [thread:$0]  (!%p4544_p7), %s5416_s3, 12288, %s4531_s14, [#allocation9], %s5373_s29, %s5373_s29, %s5375_s13  }
  0x34   : > { %s5418_s5 = sld [smem:[#allocation33_spill]] }
  0x3a   : > { %s4147_s23 = scalar_lea.hbm %s5418_s5, 2048 }
  0x3b   : > { %p4148_p1 = scmp.ne.s32.totalorder %s5418_s5, %s4147_s23  ;;  %p4154_p12 = scmp.lt.u32.totalorder %s4147_s23, %s5418_s5 }
  0x3d   : > { %p4150_p5 = pnand %p4148_p1, %p4556_p9 }
  0x3f   : > { %p4151_p11 = pneg %p4150_p5 }
  0x41   : > { %p4156_p13 = pnand %p4154_p12, %p4151_p11 }
  0x43   : > { %4159 = shalt.err (!%p4156_p13)
}
  0x44   : > { %s4160_s14 = scalar_lea.vmem %s4540_s18, 2048  ;;  %p4168_p8 = scmp.lt.s32.totalorder %s4540_s18, %s4540_s18 }
  0x45   : > { %p4161_p0 = scmp.ne.s32.totalorder %s4540_s18, %s4160_s14  ;;  %p4169_p10 = scmp.lt.s32.totalorder %s4160_s14, %s4160_s14 }
  0x47   : > { %p4163_p3 = pnand %p4161_p0, %p4556_p9  ;;  %p4170_p1 = por %p4169_p10, %p4168_p8 }
  0x49   : > { %p4164_p6 = pneg %p4163_p3 }
  0x4b   : > { %p4171_p5 = pnand %p4170_p1, %p4164_p6 }
  0x4d   : > { %4174 = shalt.err (!%p4171_p5)
}
  0x4e   : > { %s4437_s17 = smov 64   ;;  %s4438_s20 = smov 4  }
  0x4f   : > { %3727 = dma.hbm_to_vmem [thread:$0]  (!%p4544_p7), %s5418_s5, 2048, %s4540_s18, [#allocation12], %s4437_s17, %s4437_s17, %s4438_s20  }
  0x50   : > { %s3315_s23 = sadd.s32 4294967294, %s4431_s12   ;;  %s4605_s24 = sadd.s32 1, %s4431_s12  }
  0x51   : > { %5419 = sst [smem:[#allocation26_spill]] %s4605_s24  ;;  %s38_s26 = sadd.s32 1, %s4427_s11 }
  0x52   : > { %s35_s27 = ssub.s32 %s4431_s12, %s4605_s24  ;;  %p45_p11 = scmp.ne.s32.totalorder %s4427_s11, %s4423_s10 }
  0x53   : > { %p36_p12 = scmp.eq.s32.totalorder %s35_s27, 0  ;;  %p46_p13 = scmp.eq.s32.totalorder %s4431_s12, 0 }
  0x54   : > { %p51_p0 = scmp.ne.s32.totalorder %s4423_s10, %s4419_s30  ;;  %p4617_p3 = por %p253_p2, %p45_p11 }
  0x55   : > { %s4622_s14 = scalar_select %p36_p12, %s4427_s11, %s38_s26  }
  0x56   : > { %s5420_s28 = scalar_select %p4617_p3, 1, 0 }
  0x57   : > { %5422 = sst [smem:[#allocation28_spill]] %s4622_s14  ;;  %p47_p6 = por %p46_p13, %p45_p11 }
  0x58   : > { %5421 = sst [smem:[#allocation27_spill]] %s5420_s28  ;;  %p5423_p8 = scmp.eq.s32.totalorder %s4525_s15, 0 }
  0x59   : > { %p259_p1 = scmp.eq.s32.totalorder %s3315_s23, 1  ;;  %p3753_p5 = scmp.lt.s32.totalorder %s4431_s12, 2 }
  0x5a   : > { %p4626_p10 = por %p5423_p8, %p51_p0  ;;  %s4632_s17 = sand.u32 1, %s4427_s11  }
  0x5b   : > { %p4634_p4 = por %p259_p1, %p51_p0  ;;  %p4638_p2 = pnand %p3753_p5, %p47_p6 }
  0x5c   : > { %s5424_s18 = scalar_select %p4626_p10, 1, 0 }
  0x5d   : > { %s5426_s20 = scalar_select %p4634_p4, 1, 0 }
  0x5e   : > { %5425 = sst [smem:[#allocation29_spill]] %s5424_s18  ;;  %s367_s22 = sand.u32 1, %s4431_s12  }
  0x5f   : > { %5427 = sst [smem:[#allocation30_spill]] %s5426_s20  ;;  %s5380_s26 = sshll.u32 %s4632_s17, 6 }
  0x60   : > { %s5428_s21 = scalar_select %p4638_p2, 1, 0 }
  0x61   : > { %s5381_s27 = sshll.u32 %s4431_s12, 10  ;;  %s5429_s1 = sld [smem:[#allocation31_spill]] }
  0x62   : > { %s371_s3 = scalar_lea.vmem [#allocation5], %s5380_s26  ;;  %s4656_s14 = scalar_lea.sflag [#allocation6], %s367_s22 }
  0x63   : > { %s379_s5 = sshll.u32 %s371_s3, 4  ;;  %p4662_p12 = pneg %p4638_p2  ;;  %s4654_s5 = int_to_ptr.vmem [resolvable:$true] %s379_s5 }
  0x65   : > { %s5430_s24 = scalar_select %p4662_p12, 1, 0 }
  0x67   : > { %s4650_s13 = scalar_lea.hbm %s5429_s1, %s5381_s27  ;;  %s4180_s26 = scalar_lea.hbm %s5429_s1, 2048 }
  0x68   : > { %s4175_s11 = scalar_lea.hbm %s4650_s13, 1024  ;;  %p4181_p6 = scmp.lt.u32.totalorder %s4650_s13, %s5429_s1 }
  0x69   : > { %p4176_p11 = scmp.ne.s32.totalorder %s4650_s13, %s4175_s11  ;;  %p4182_p8 = scmp.lt.u32.totalorder %s4180_s26, %s4175_s11 }
  0x6a   : > { %p4184_p5 = scmp.lt.u32.totalorder %s4175_s11, %s4650_s13 }
  0x6b   : > { %p4178_p13 = pnand %p4662_p12, %p4176_p11  ;;  %p4183_p1 = por %p4182_p8, %p4181_p6 }
  0x6d   : > { %p4179_p0 = pneg %p4178_p13  ;;  %p4185_p4 = por %p4184_p5, %p4183_p1 }
  0x6f   : > { %p4186_p3 = pnand %p4185_p4, %p4179_p0 }
  0x71   : > { %4189 = shalt.err (!%p4186_p3)
}
  0x72   : > { %s4190_s22 = scalar_lea.vmem %s4654_s5, 1024  ;;  %s4439_s29 = smov [#allocation5]  }
  0x73   : > { %p4191_p11 = scmp.ne.s32.totalorder %s4654_s5, %s4190_s22  ;;  %s4195_s23 = sshll.u32 %s4439_s29, 4  ;;  %s4196_s23 = int_to_ptr.vmem [resolvable:$false] %s4195_s23 }
  0x74   : > { %s4197_s27 = scalar_lea.vmem %s4196_s23, 2048  ;;  %p4198_p7 = scmp.lt.s32.totalorder %s4654_s5, %s4196_s23 }
  0x75   : > { %p4193_p13 = pnand %p4191_p11, %p4662_p12  ;;  %p4199_p9 = scmp.lt.s32.totalorder %s4197_s27, %s4190_s22 }
  0x77   : > { %p4194_p10 = pneg %p4193_p13  ;;  %p4200_p6 = por %p4199_p9, %p4198_p7 }
  0x79   : > { %p4201_p8 = pnand %p4200_p6, %p4194_p10 }
  0x7b   : > { %4204 = shalt.err (!%p4201_p8)
}
  0x7c   : > { %s5400_s11 = smov 256   ;;  %s5402_s26 = smov 16  }
  0x7d   : > { %3740 = dma.hbm_to_vmem [thread:$0]  (!%p4638_p2), %s4650_s13, 1024, %s4654_s5, %s4656_s14, %s5400_s11, %s5400_s11, %s5402_s26  }
  0x7e   : > { %s5431_s3 = sshll.u32 %s4431_s12, 10  ;;  %s5432_s27 = sshll.u32 %s4632_s17, 6 }
  0x7f   : > { %s4694_s23 = scalar_lea.hbm %s5363_s2, %s5431_s3  ;;  %s4698_s1 = scalar_lea.vmem [#allocation7], %s5432_s27 }
  0x80   : > { %s4442_s30 = smov [#allocation10]   ;;  %s4205_s15 = scalar_lea.hbm %s5365_s4, 4096 }
  0x81   : > { %s291_s9 = sshll.u32 %s4442_s30, 4  ;;  %p4206_p4 = scmp.ne.s32.totalorder %s5365_s4, %s4205_s15  ;;  %s292_s9 = int_to_ptr.vmem [resolvable:$true] %s291_s9 }
  0x82   : > { %p5433_p7 = scmp.ne.s32.totalorder %s5417_s25, 0  ;;  %p4212_p10 = scmp.lt.u32.totalorder %s4205_s15, %s5365_s4 }
  0x84   : > { %p4208_p9 = pnand %p4206_p4, %p5433_p7 }
  0x86   : > { %p4209_p3 = pneg %p4208_p9 }
  0x88   : > { %p4214_p0 = pnand %p4212_p10, %p4209_p3 }
  0x8a   : > { %4217 = shalt.err (!%p4214_p0)
}
  0x8b   : > { %s4218_s29 = scalar_lea.vmem %s292_s9, 4096  ;;  %p4226_p13 = scmp.lt.s32.totalorder %s292_s9, %s292_s9 }
  0x8c   : > { %p4219_p1 = scmp.ne.s32.totalorder %s292_s9, %s4218_s29  ;;  %p4227_p6 = scmp.lt.s32.totalorder %s4218_s29, %s4218_s29 }
  0x8e   : > { %p4221_p5 = pnand %p4219_p1, %p5433_p7  ;;  %p4228_p8 = por %p4227_p6, %p4226_p13 }
  0x90   : > { %p4222_p11 = pneg %p4221_p5 }
  0x92   : > { %p4229_p2 = pnand %p4228_p8, %p4222_p11 }
  0x94   : > { %4232 = shalt.err (!%p4229_p2)
}
  0x95   : > { %p5434_p4 = scmp.ne.s32.totalorder %s5415_s19, 0  ;;  %s5435_s7 = smov 8  }
  0x96   : > { %s5436_s30 = smov 128   ;;  %s4443_s18 = smov [#allocation13]  }
  0x97   : > { %3724 = dma.hbm_to_vmem [thread:$0]  (!%p5434_p4), %s5365_s4, 4096, %s292_s9, [#allocation9], %s5436_s30, %s5436_s30, %s5435_s7  }
  0x98   : > { %s317_s22 = sshll.u32 %s4443_s18, 4  ;;  %s4444_s27 = smov [#allocation14]   ;;  %s318_s22 = int_to_ptr.vmem [resolvable:$true] %s317_s22 }
  0x99   : > { %s334_s5 = sshll.u32 %s4444_s27, 4  ;;  %s4233_s29 = scalar_lea.hbm %s5367_s6, 2048  ;;  %s335_s5 = int_to_ptr.vmem [resolvable:$true] %s334_s5 }
  0x9a   : > { %p4234_p2 = scmp.ne.s32.totalorder %s5367_s6, %s4233_s29  ;;  %p4240_p10 = scmp.lt.u32.totalorder %s4233_s29, %s5367_s6 }
  0x9c   : > { %p4236_p9 = pnand %p4234_p2, %p5433_p7 }
  0x9e   : > { %p4237_p3 = pneg %p4236_p9 }
  0xa0   : > { %p4242_p0 = pnand %p4240_p10, %p4237_p3 }
  0xa2   : > { %4245 = shalt.err (!%p4242_p0)
}
  0xa3   : > { %s4246_s9 = scalar_lea.vmem %s318_s22, 2048  ;;  %p4254_p13 = scmp.lt.s32.totalorder %s318_s22, %s318_s22 }
  0xa4   : > { %p4247_p1 = scmp.ne.s32.totalorder %s318_s22, %s4246_s9  ;;  %p4255_p6 = scmp.lt.s32.totalorder %s4246_s9, %s4246_s9 }
  0xa6   : > { %p4249_p5 = pnand %p4247_p1, %p5433_p7  ;;  %p4256_p8 = por %p4255_p6, %p4254_p13 }
  0xa8   : > { %p4250_p11 = pneg %p4249_p5 }
  0xaa   : > { %p4257_p12 = pnand %p4256_p8, %p4250_p11 }
  0xac   : > { %4260 = shalt.err (!%p4257_p12)
}
  0xad   : > { %3730 = dma.hbm_to_vmem [thread:$0]  (!%p5434_p4), %s5367_s6, 2048, %s318_s22, [#allocation12], %s5436_s30, %s5436_s30, %s5435_s7  }
  0xae   : > { %s4261_s18 = scalar_lea.hbm %s5369_s8, 256 }
  0xaf   : > { %p4262_p2 = scmp.ne.s32.totalorder %s5369_s8, %s4261_s18  ;;  %p4268_p3 = scmp.lt.u32.totalorder %s4261_s18, %s5369_s8 }
  0xb1   : > { %p4264_p12 = pnand %p4262_p2, %p5433_p7 }
  0xb3   : > { %p4265_p9 = pneg %p4264_p12 }
  0xb5   : > { %p4270_p10 = pnand %p4268_p3, %p4265_p9 }
  0xb7   : > { %4273 = shalt.err (!%p4270_p10)
}
  0xb8   : > { %s4274_s28 = scalar_lea.vmem %s335_s5, 256  ;;  %p4282_p11 = scmp.lt.s32.totalorder %s335_s5, %s335_s5 }
  0xb9   : > { %p4275_p0 = scmp.ne.s32.totalorder %s335_s5, %s4274_s28  ;;  %p4283_p13 = scmp.lt.s32.totalorder %s4274_s28, %s4274_s28 }
  0xbb   : > { %p4277_p1 = pnand %p4275_p0, %p5433_p7  ;;  %p4284_p6 = por %p4283_p13, %p4282_p11 }
  0xbd   : > { %p4278_p5 = pneg %p4277_p1 }
  0xbf   : > { %p4285_p8 = pnand %p4284_p6, %p4278_p5 }
  0xc1   : > { %4288 = shalt.err (!%p4285_p8)
}
  0xc2   : > { %3733 = dma.hbm_to_vmem [thread:$0]  (!%p5434_p4), %s5369_s8, 256, %s335_s5, [#allocation15]  }
  0xc3   : > { %s3323_s22 = sshll.u32 %s4632_s17, 5  ;;  %s3533_s25 = sshll.u32 %s4431_s12, 9 }
  0xc4   : > { %s4766_s11 = scalar_lea.hbm %s5361_s0, %s3533_s25  ;;  %s5437_s26 = sshll.u32 %s4698_s1, 4  ;;  %s4770_s26 = int_to_ptr.vmem [resolvable:$true] %s5437_s26 }
  0xc5   : > { %s349_s19 = scalar_lea.vmem [#allocation2], %s3323_s22  ;;  %s346_s18 = scalar_lea.sflag [#allocation3], %s4632_s17 }
  0xc6   : > { %s357_s15 = sshll.u32 %s349_s19, 4  ;;  %s4289_s5 = scalar_lea.hbm %s4766_s11, 512  ;;  %s4772_s15 = int_to_ptr.vmem [resolvable:$true] %s357_s15 }
  0xc7   : > { %p4290_p7 = scmp.ne.s32.totalorder %s4766_s11, %s4289_s5  ;;  %p5438_p4 = scmp.ne.s32.totalorder %s5430_s24, 0 }
  0xc8   : > { %s4294_s1 = scalar_lea.hbm %s5361_s0, 1024  ;;  %p4295_p9 = scmp.lt.u32.totalorder %s4766_s11, %s5361_s0 }
  0xc9   : > { %p4292_p2 = pnand %p4290_p7, %p5438_p4  ;;  %p4296_p3 = scmp.lt.u32.totalorder %s4294_s1, %s4289_s5 }
  0xca   : > { %p4298_p0 = scmp.lt.u32.totalorder %s4289_s5, %s4766_s11 }
  0xcb   : > { %p4293_p12 = pneg %p4292_p2  ;;  %p4297_p10 = por %p4296_p3, %p4295_p9 }
  0xcd   : > { %p4299_p1 = por %p4298_p0, %p4297_p10 }
  0xcf   : > { %p4300_p5 = pnand %p4299_p1, %p4293_p12 }
  0xd1   : > { %4303 = shalt.err (!%p4300_p5)
}
  0xd2   : > { %s4304_s28 = scalar_lea.vmem %s4772_s15, 512  ;;  %s4445_s7 = smov [#allocation2]  }
  0xd3   : > { %p4305_p11 = scmp.ne.s32.totalorder %s4772_s15, %s4304_s28  ;;  %s4309_s30 = sshll.u32 %s4445_s7, 4  ;;  %s4310_s30 = int_to_ptr.vmem [resolvable:$false] %s4309_s30 }
  0xd4   : > { %s4311_s22 = scalar_lea.vmem %s4310_s30, 1024  ;;  %p4312_p8 = scmp.lt.s32.totalorder %s4772_s15, %s4310_s30 }
  0xd5   : > { %p4307_p13 = pnand %p4305_p11, %p5438_p4  ;;  %p4313_p7 = scmp.lt.s32.totalorder %s4311_s22, %s4304_s28 }
  0xd7   : > { %p4308_p6 = pneg %p4307_p13  ;;  %p4314_p2 = por %p4313_p7, %p4312_p8 }
  0xd9   : > { %p4315_p9 = pnand %p4314_p2, %p4308_p6 }
  0xdb   : > { %4318 = shalt.err (!%p4315_p9)
}
  0xdc   : > { %p5439_p12 = scmp.ne.s32.totalorder %s5428_s21, 0  ;;  %s5440_s25 = smov 16  }
  0xdd   : > { %s5441_s9 = smov 256   ;;  %s4319_s20 = scalar_lea.hbm %s4694_s23, 1024 }
  0xde   : > { %3737 = dma.hbm_to_vmem [thread:$0]  (!%p5439_p12), %s4766_s11, 512, %s4772_s15, %s346_s18, %s5441_s9, %s5441_s9, %s5440_s25  }
  0xdf   : > { %p4320_p3 = scmp.ne.s32.totalorder %s4694_s23, %s4319_s20  ;;  %s4324_s27 = scalar_lea.hbm %s5363_s2, 2048 }
  0xe0   : > { %p4325_p1 = scmp.lt.u32.totalorder %s4694_s23, %s5363_s2  ;;  %p4326_p5 = scmp.lt.u32.totalorder %s4324_s27, %s4319_s20 }
  0xe1   : > { %p4322_p10 = pnand %p4320_p3, %p5438_p4  ;;  %p4328_p13 = scmp.lt.u32.totalorder %s4319_s20, %s4694_s23 }
  0xe2   : > { %p4327_p11 = por %p4326_p5, %p4325_p1 }
  0xe3   : > { %p4323_p0 = pneg %p4322_p10 }
  0xe4   : > { %p4329_p6 = por %p4328_p13, %p4327_p11 }
  0xe6   : > { %p4330_p8 = pnand %p4329_p6, %p4323_p0 }
  0xe8   : > { %4333 = shalt.err (!%p4330_p8)
}
  0xe9   : > { %s4334_s17 = scalar_lea.vmem %s4770_s26, 1024  ;;  %s4446_s11 = smov [#allocation7]  }
  0xea   : > { %p4335_p7 = scmp.ne.s32.totalorder %s4770_s26, %s4334_s17  ;;  %s4339_s15 = sshll.u32 %s4446_s11, 4  ;;  %s4340_s15 = int_to_ptr.vmem [resolvable:$false] %s4339_s15 }
  0xeb   : > { %s4341_s18 = scalar_lea.vmem %s4340_s15, 2048  ;;  %p4342_p3 = scmp.lt.s32.totalorder %s4770_s26, %s4340_s15 }
  0xec   : > { %p4337_p2 = pnand %p4335_p7, %p5438_p4  ;;  %p4343_p10 = scmp.lt.s32.totalorder %s4341_s18, %s4334_s17 }
  0xee   : > { %p4338_p9 = pneg %p4337_p2  ;;  %p4344_p1 = por %p4343_p10, %p4342_p3 }
  0xf0   : > { %p4345_p5 = pnand %p4344_p1, %p4338_p9 }
  0xf2   : > { %4348 = shalt.err (!%p4345_p5)
}
  0xf3   : > { %3743 = dma.hbm_to_vmem [thread:$0]  (!%p5439_p12), %s4694_s23, 1024, %s4770_s26, %s4656_s14, %s5441_s9, %s5441_s9, %s5440_s25  }
  0xf4   : > { %p5442_p4 = scmp.ne.s32.totalorder %s5414_s16, 0 }
  0xf5   : > { %s5443_s24 = sld [smem:[#allocation29_spill]] (!%p5442_p4)  ;;  %s4829_s3 = sand.u32 (!%p5442_p4), 1, %s4423_s10  }
  0xf6   : > { %413 = sbr.rel (%p5442_p4) target bundleno = 4360 (0x1108), region = 56  ;;  %s3336_s29 = sshll.u32 (!%p5442_p4), %s4829_s3, 5 }
  0xf7   : > { %s416_s28 = scalar_lea.sflag (!%p5442_p4), [#allocation3], %s4829_s3  ;;  %s4835_s21 = scalar_lea.vmem (!%p5442_p4), [#allocation2], %s3336_s29 }
  0xfb   : > { %p5444_p0 = scmp.ne.s32.totalorder (!%p5442_p4), %s5443_s24, 0 }
  0xfd   : > { %4394 = dma.done.wait (%p5444_p0), %s416_s28, 512  }
  0xfe   : > { %4396 = vsyncadd (%p5444_p0), %s416_s28, 4294966784  ;;  %s5445_s14 = sld [smem:[#allocation25_spill]]  ;;  %s3337_s23 = sshll.u32 %s4829_s3, 6 }
  0xff   : > { %s428_s7 = scalar_lea.vmem [#allocation5], %s3337_s23 }
 0x104   : > { %s424_s16 = sand.u32 1, %s5445_s14  }
 0x105   : > { %s425_s26 = scalar_lea.sflag [#allocation6], %s424_s16 }
 0x106   : > { %4398 = dma.done.wait (%p5444_p0), %s425_s26, 2048  }
 0x107   : > { %4400 = vsyncadd (%p5444_p0), %s425_s26, 4294965248  ;;  %s4847_s30 = scalar_lea.vmem [#allocation7], %s3337_s23  ;;  %p5446_p12 = scmp.eq.s32.totalorder %s5445_s14, 0 }
 0x109   : > { %4402 = dma.done.wait (%p5446_p12), [#allocation9], 16384   ;;  %p5447_p11 = pmov %p5446_p12 }
 0x10b   : > { %4404 = vsyncadd (%p5447_p11), [#allocation9], 4294950912  ;;  %p5448_p13 = pmov %p5447_p11 }
 0x10c   : > { %p5449_p6 = pmov %p5447_p11 }
 0x10d   : > { %4406 = dma.done.wait (%p5448_p13), [#allocation12], 4096  }
 0x10e   : > { %4408 = vsyncadd (%p5449_p6), [#allocation12], 4294963200  ;;  %p5450_p8 = pmov %p5449_p6 }
 0x10f   : > { %p5451_p7 = pmov %p5449_p6 }
 0x110   : > { %4410 = dma.done.wait (%p5450_p8), [#allocation15], 256  }
 0x111   : > { %4412 = vsyncadd (%p5451_p7), [#allocation15], 4294967040  ;;  %v4861_v0 = vld [vmem:[%s428_s7] sm:$0xff]  ;;  %v4863_v1 = vld [vmem:[%s428_s7 + $0x8] sm:$0xff]  ;;  %s5452_s9 = sld [smem:[#allocation34_spill]]  ;;  %vm4448_vm0 = vmmov 0  }
 0x112   : > { %v4865_v2 = vld [vmem:[%s428_s7 + $0x20] sm:$0xff]  ;;  %v591_v3 = vadd.f32 %v4863_v1, %v4861_v0  ;;  %v4869_v4 = vld [vmem:[%s428_s7 + $0x28] sm:$0xff]  ;;  %v4871_v5 = vld [vmem:[%s428_s7 + $0x10] sm:$0xff]  ;;  %vm1586_vm1 = vcmask 523264   ;;  %vm1681_vm2 = vcmask 130048   ;;  %s4449_s24 = smov 64  }
 0x113   : > { %v4873_v6 = vld [vmem:[%s428_s7 + $0x18] sm:$0xff]  ;;  %v597_v7 = vadd.f32 %v4869_v4, %v4865_v2  ;;  %v4877_v8 = vld [vmem:[%s428_s7 + $0x30] sm:$0xff]  ;;  %v4882_v10 = vld [vmem:[%s4835_s21] sm:$0xff]  ;;  %s3539_s26 = sshll.u32 %s5445_s14, 9  ;;  %s5453_s22 = sld [smem:[#allocation27_spill]] }
 0x114   : > { %v4879_v9 = vld [vmem:[%s428_s7 + $0x38] sm:$0xff]  ;;  %592 = vadd.xlane.f32.xlu0 %v591_v3  ;;  %v594_v11 = vadd.f32 %v4873_v6, %v4871_v5  ;;  %v4887_v12 = vld [vmem:[%s4835_s21 + $0x8] sm:$0xff]  ;;  %v4890_v13 = vld [vmem:[%s4835_s21 + $0x10] sm:$0xff]  ;;  %s501_s7 = scalar_lea.vmem [#allocation16], %s3336_s29  ;;  %s5454_s19 = sld [smem:[#allocation35_spill]] }
 0x115   : > { %v4893_v14 = vld [vmem:[%s4835_s21 + $0x18] sm:$0xff]  ;;  %598 = vadd.xlane.f32.xlu1 %v597_v7  ;;  %v600_v15 = vadd.f32 %v4879_v9, %v4877_v8  ;;  %v514_v16 = vadd.f32 %v4887_v12, %v4882_v10  ;;  %v3819_v18 = vld [vmem:[#allocation8 + $0x104] ss:$8 sps:$4 sm:$0xff]   ;;  %v3821_v19 = vld [vmem:[#allocation8 + $0x100] ss:$8 sps:$4 sm:$0xff]   ;;  %s3137_s29 = scalar_lea.sflag [#allocation4], %s4829_s3 }
 0x116   : > { %v517_v17 = vadd.f32 %v4893_v14, %v4890_v13  ;;  %v3822_v20 = vld [vmem:[#allocation8 + $0x114] ss:$8 sps:$4 sm:$0xff]   ;;  %1268 = vmatprep.subr.bf16.mxu1 %v3819_v18  ;;  %v3825_v21 = vld [vmem:[#allocation8 + $0x4] ss:$8 sps:$4 sm:$0xff]   ;;  %v3829_v22 = vld [vmem:[#allocation8] ss:$8 sps:$4 sm:$0xff]  }
 0x117   : > { %1269 = vmatpush1.bf16.msra.mxu1 %v3821_v19  ;;  %v3824_v23 = vld [vmem:[#allocation8 + $0x110] ss:$8 sps:$4 sm:$0xff]   ;;  %v3831_v24 = vld [vmem:[#allocation8 + $0x14] ss:$8 sps:$4 sm:$0xff]   ;;  %1019 = vmatprep.subr.bf16.mxu0 %v3825_v21  ;;  %v3827_v25 = vld [vmem:[#allocation8 + $0x124] ss:$8 sps:$4 sm:$0xff]  }
 0x118   : > { %595 = vadd.xlane.f32.xlu0 %v594_v11  ;;  %1270 = vmatprep.subr.bf16.mxu1 %v3822_v20  ;;  %v3835_v26 = vld [vmem:[#allocation8 + $0x10] ss:$8 sps:$4 sm:$0xff]   ;;  %v3837_v27 = vld [vmem:[#allocation8 + $0x24] ss:$8 sps:$4 sm:$0xff]   ;;  %v3830_v28 = vld [vmem:[#allocation8 + $0x120] ss:$8 sps:$4 sm:$0xff]  }
 0x119   : > { %601 = vadd.xlane.f32.xlu1 %v600_v15  ;;  %1020 = vmatpush1.bf16.msra.mxu0 %v3829_v22  ;;  %v3833_v29 = vld [vmem:[#allocation8 + $0x134] ss:$8 sps:$4 sm:$0xff]   ;;  %v3841_v30 = vld [vmem:[#allocation8 + $0x20] ss:$8 sps:$4 sm:$0xff]   ;;  %v3836_v31 = vld [vmem:[#allocation8 + $0x130] ss:$8 sps:$4 sm:$0xff]  }
 0x11a   : > { %1021 = vmatprep.subr.bf16.mxu0 %v3831_v24  ;;  %v3839_v32 = vld [vmem:[#allocation8 + $0x144] ss:$8 sps:$4 sm:$0xff]   ;;  %v3843_v33 = vld [vmem:[#allocation8 + $0x34] ss:$8 sps:$4 sm:$0xff]   ;;  %v3847_v34 = vld [vmem:[#allocation8 + $0x30] ss:$8 sps:$4 sm:$0xff]   ;;  %s5314_s5 = scalar_lea.hbm %s5454_s19, %s3539_s26 }
 0x11b   : > { %1271 = vmatpush1.bf16.msra.mxu1 %v3824_v23  ;;  %v3849_v35 = vld [vmem:[#allocation8 + $0x44] ss:$8 sps:$4 sm:$0xff]   ;;  %v3842_v36 = vld [vmem:[#allocation8 + $0x140] ss:$8 sps:$4 sm:$0xff]   ;;  %v3845_v37 = vld [vmem:[#allocation8 + $0x154] ss:$8 sps:$4 sm:$0xff]  }
 0x11c   : > { %515 = vadd.xlane.f32.xlu0 %v514_v16  ;;  %1272 = vmatprep.subr.bf16.mxu1 %v3827_v25  ;;  %v3853_v38 = vld [vmem:[#allocation8 + $0x40] ss:$8 sps:$4 sm:$0xff]   ;;  %v3855_v39 = vld [vmem:[#allocation8 + $0x54] ss:$8 sps:$4 sm:$0xff]   ;;  %v3848_v40 = vld [vmem:[#allocation8 + $0x150] ss:$8 sps:$4 sm:$0xff]  }
 0x11d   : > { %518 = vadd.xlane.f32.xlu1 %v517_v17  ;;  %1022 = vmatpush1.bf16.msra.mxu0 %v3835_v26  ;;  %v3851_v41 = vld [vmem:[#allocation8 + $0x164] ss:$8 sps:$4 sm:$0xff]   ;;  %v3859_v42 = vld [vmem:[#allocation8 + $0x50] ss:$8 sps:$4 sm:$0xff]   ;;  %v3854_v44 = vld [vmem:[#allocation8 + $0x160] ss:$8 sps:$4 sm:$0xff]  }
 0x11e   : > { %1023 = vmatprep.subr.bf16.mxu0 %v3837_v27  ;;  %v3861_v43 = vld [vmem:[#allocation8 + $0x64] ss:$8 sps:$4 sm:$0xff]   ;;  %v3857_v45 = vld [vmem:[#allocation8 + $0x174] ss:$8 sps:$4 sm:$0xff]   ;;  %v3865_v46 = vld [vmem:[#allocation8 + $0x60] ss:$8 sps:$4 sm:$0xff]  }
 0x11f   : > { %1273 = vmatpush1.bf16.msra.mxu1 %v3830_v28  ;;  %v3860_v47 = vld [vmem:[#allocation8 + $0x170] ss:$8 sps:$4 sm:$0xff]   ;;  %v3863_v48 = vld [vmem:[#allocation8 + $0x184] ss:$8 sps:$4 sm:$0xff]   ;;  %v3866_v49 = vld [vmem:[#allocation8 + $0x180] ss:$8 sps:$4 sm:$0xff]  }
 0x120   : > { %1274 = vmatprep.subr.bf16.mxu1 %v3833_v29  ;;  %v4965_v27 = vld [vmem:[%s4847_s30 + $0x8] sm:$0xff]  ;;  %p5455_p9 = scmp.ne.s32.totalorder %s5453_s22, 0  ;;  %s4451_s27 = smov [#allocation16]  }
 0x121   : > { %1024 = vmatpush1.bf16.msra.mxu0 %v3841_v30  ;;  %v4968_v30 = vld [vmem:[%s4847_s30 + $0x10] sm:$0xff]  ;;  %s4353_s13 = sshll.u32 %s4451_s27, 4  ;;  %s4354_s13 = int_to_ptr.vmem [resolvable:$false] %s4353_s13 }
 0x122   : > { %1025 = vmatprep.subr.bf16.mxu0 %v3843_v33  ;;  %v4976_v33 = vld [vmem:[%s4847_s30 + $0x20] sm:$0xff]  ;;  %s4355_s1 = scalar_lea.vmem %s4354_s13, 1024 }
 0x123   : > { %1275 = vmatpush1.bf16.msra.mxu1 %v3836_v31 }
 0x124   : > { %1276 = vmatprep.subr.bf16.mxu1 %v3839_v32  ;;  %v4973_v32 = vld [vmem:[%s4847_s30 + $0x18] sm:$0xff] }
 0x125   : > { %1026 = vmatpush1.bf16.msra.mxu0 %v3847_v34  ;;  %v4979_v34 = vld [vmem:[%s4847_s30 + $0x28] sm:$0xff] }
 0x126   : > { %1027 = vmatprep.subr.bf16.mxu0 %v3849_v35  ;;  %v712_v35 = vadd.f32 %v4973_v32, %v4968_v30 }
 0x127   : > { %1277 = vmatpush1.bf16.msra.mxu1 %v3842_v36  ;;  %v4984_v36 = vld [vmem:[%s4847_s30 + $0x30] sm:$0xff] }
 0x128   : > { %1278 = vmatprep.subr.bf16.mxu1 %v3845_v37  ;;  %v715_v37 = vadd.f32 %v4979_v34, %v4976_v33 }
 0x129   : > { %1028 = vmatpush1.bf16.msra.mxu0 %v3853_v38  ;;  %v3867_v38 = vld [vmem:[#allocation8 + $0x74] ss:$8 sps:$4 sm:$0xff]  }
 0x12a   : > { %1029 = vmatprep.subr.bf16.mxu0 %v3855_v39  ;;  %v3869_v39 = vld [vmem:[#allocation8 + $0x194] ss:$8 sps:$4 sm:$0xff]  }
 0x12b   : > { %1279 = vmatpush1.bf16.msra.mxu1 %v3848_v40  ;;  %v4989_v40 = vld [vmem:[%s4847_s30 + $0x38] sm:$0xff] }
 0x12c   : > { %1280 = vmatprep.subr.bf16.mxu1 %v3851_v41  ;;  %v3871_v41 = vld [vmem:[#allocation8 + $0x70] ss:$8 sps:$4 sm:$0xff]  }
 0x12d   : > { %1030 = vmatpush1.bf16.msra.mxu0 %v3859_v42  ;;  %v3872_v42 = vld [vmem:[#allocation8 + $0x190] ss:$8 sps:$4 sm:$0xff]  }
 0x12e   : > { %1031 = vmatprep.subr.bf16.mxu0 %v3861_v43  ;;  %v718_v43 = vadd.f32 %v4989_v40, %v4984_v36 }
 0x12f   : > { %1281 = vmatpush1.bf16.msra.mxu1 %v3854_v44  ;;  %v3873_v44 = vld [vmem:[#allocation8 + $0x84] ss:$8 sps:$4 sm:$0xff]  }
 0x130   : > { %1282 = vmatprep.subr.bf16.mxu1 %v3857_v45  ;;  %v3875_v45 = vld [vmem:[#allocation8 + $0x1a4] ss:$8 sps:$4 sm:$0xff]  }
 0x131   : > { %1032 = vmatpush1.bf16.msra.mxu0 %v3865_v46  ;;  %v3877_v46 = vld [vmem:[#allocation8 + $0x80] ss:$8 sps:$4 sm:$0xff]  }
 0x132   : > { %1033 = vmatprep.subr.bf16.mxu0 %v3867_v38 }
 0x133   : > { %1283 = vmatpush1.bf16.msra.mxu1 %v3860_v47  ;;  %v3878_v47 = vld [vmem:[#allocation8 + $0x1a0] ss:$8 sps:$4 sm:$0xff]  }
 0x134   : > { %1284 = vmatprep.subr.bf16.mxu1 %v3863_v48  ;;  %v3879_v48 = vld [vmem:[#allocation8 + $0x94] ss:$8 sps:$4 sm:$0xff]  }
 0x135   : > { %1034 = vmatpush1.bf16.msra.mxu0 %v3871_v41 }
 0x136   : > { %1035 = vmatprep.subr.bf16.mxu0 %v3873_v44 }
 0x137   : > { %1285 = vmatpush1.bf16.msra.mxu1 %v3866_v49  ;;  %v3881_v49 = vld [vmem:[#allocation8 + $0x1b4] ss:$8 sps:$4 sm:$0xff]  }
 0x138   : > { %1286 = vmatprep.subr.bf16.mxu1 %v3869_v39 }
 0x139   : > { %1036 = vmatpush1.bf16.msra.mxu0 %v3877_v46  ;;  %v3346_v46 = vld [vmem:[%s5452_s9 + $0x2] ss:$8 sm:$0x3] }
 0x13a   : > { %1037 = vmatprep.subr.bf16.mxu0 %v3879_v48 }
 0x13b   : > { %1287 = vmatpush1.bf16.msra.mxu1 %v3872_v42 }
 0x13c   : > { %1288 = vmatprep.subr.bf16.mxu1 %v3875_v45 }
 0x13f   : > { %1289 = vmatpush1.bf16.msra.mxu1 %v3878_v47 }
 0x140   : > { %1290 = vmatprep.subr.bf16.mxu1 %v3881_v49 }
 0x1a1   : > { %v593_v50 = vpop.xlane.xlu0 %592 }
 0x1a2   : > { %v603_v51 = vmul.f32 0.00390625, %v593_v50  ;;  %v599_v52 = vpop.xlane.xlu1 %598  ;;  %v3883_v50 = vld [vmem:[#allocation8 + $0x90] ss:$8 sps:$4 sm:$0xff]  }
 0x1a3   : > { %v605_v53 = vmul.f32 0.00390625, %v599_v52  ;;  %1038 = vmatpush1.bf16.msra.mxu0 %v3883_v50  ;;  %v3885_v52 = vld [vmem:[#allocation8 + $0xa4] ss:$8 sps:$4 sm:$0xff]  }
 0x1a4   : > { %v4902_v54 = vsub.f32 %v4861_v0, %v603_v51  ;;  %v4905_v55 = vsub.f32 %v4863_v1, %v603_v51  ;;  %v3884_v51 = vld [vmem:[#allocation8 + $0x1b0] ss:$8 sps:$4 sm:$0xff]   ;;  %1039 = vmatprep.subr.bf16.mxu0 %v3885_v52  ;;  %v3347_v52 = vld [vmem:[%s5452_s9 + $0x3] ss:$8 sm:$0x3] }
 0x1a5   : > { %v4908_v56 = vsub.f32 %v4865_v2, %v605_v53  ;;  %v4911_v57 = vsub.f32 %v4869_v4, %v605_v53  ;;  %v596_v58 = vpop.xlane.xlu0 %595  ;;  %1291 = vmatpush1.bf16.msra.mxu1 %v3884_v51  ;;  %v3887_v53 = vld [vmem:[#allocation8 + $0x1c4] ss:$8 sps:$4 sm:$0xff]  }
 0x1a6   : > { %v604_v59 = vmul.f32 0.00390625, %v596_v58  ;;  %v602_v60 = vpop.xlane.xlu1 %601  ;;  %v615_v61 = vmul.f32 %v4902_v54, %v4902_v54  ;;  %v616_v62 = vmul.f32 %v4905_v55, %v4905_v55  ;;  %v3889_v58 = vld [vmem:[#allocation8 + $0xa0] ss:$8 sps:$4 sm:$0xff]   ;;  %1292 = vmatprep.subr.bf16.mxu1 %v3887_v53 }
 0x1a7   : > { %v606_v63 = vmul.f32 0.00390625, %v602_v60  ;;  %v619_v0 = vmul.f32 %v4908_v56, %v4908_v56  ;;  %v620_v1 = vmul.f32 %v4911_v57, %v4911_v57  ;;  %1040 = vmatpush1.bf16.msra.mxu0 %v3889_v58  ;;  %v3891_v60 = vld [vmem:[#allocation8 + $0xb4] ss:$8 sps:$4 sm:$0xff]  }
 0x1a8   : > { %v4922_v2 = vsub.f32 %v4871_v5, %v604_v59  ;;  %v4925_v3 = vsub.f32 %v4873_v6, %v604_v59  ;;  %v623_v4 = vadd.f32 %v616_v62, %v615_v61  ;;  %v3890_v59 = vld [vmem:[#allocation8 + $0x1c0] ss:$8 sps:$4 sm:$0xff]   ;;  %v3893_v61 = vld [vmem:[#allocation8 + $0x1d4] ss:$8 sps:$4 sm:$0xff]   ;;  %v3895_v62 = vld [vmem:[#allocation8 + $0xb0] ss:$8 sps:$4 sm:$0xff]   ;;  %1041 = vmatprep.subr.bf16.mxu0 %v3891_v60 }
 0x1a9   : > { %v4928_v7 = vsub.f32 %v4877_v8, %v606_v63  ;;  %v4931_v11 = vsub.f32 %v4879_v9, %v606_v63  ;;  %v516_v15 = vpop.xlane.xlu0 %515  ;;  %v629_v19 = vadd.f32 %v620_v1, %v619_v0  ;;  %1293 = vmatpush1.bf16.msra.mxu1 %v3890_v59  ;;  %v3896_v63 = vld [vmem:[#allocation8 + $0x1d0] ss:$8 sps:$4 sm:$0xff]   ;;  %v3897_v0 = vld [vmem:[#allocation8 + $0xc4] ss:$8 sps:$4 sm:$0xff]  }
 0x1aa   : > { %v521_v16 = vmul.f32 0.00390625, %v516_v15  ;;  %624 = vadd.xlane.f32.xlu0 %v623_v4  ;;  %v519_v17 = vpop.xlane.xlu1 %518  ;;  %v617_v18 = vmul.f32 %v4922_v2, %v4922_v2  ;;  %v618_v5 = vmul.f32 %v4925_v3, %v4925_v3  ;;  %1294 = vmatprep.subr.bf16.mxu1 %v3893_v61  ;;  %v3899_v1 = vld [vmem:[#allocation8 + $0x1e4] ss:$8 sps:$4 sm:$0xff]   ;;  %v3901_v4 = vld [vmem:[#allocation8 + $0xc0] ss:$8 sps:$4 sm:$0xff]  }
 0x1ab   : > { %v522_v6 = vmul.f32 0.00390625, %v519_v17  ;;  %v621_v8 = vmul.f32 %v4928_v7, %v4928_v7  ;;  %v622_v9 = vmul.f32 %v4931_v11, %v4931_v11  ;;  %1042 = vmatpush1.bf16.msra.mxu0 %v3895_v62  ;;  %v3902_v15 = vld [vmem:[#allocation8 + $0x1e0] ss:$8 sps:$4 sm:$0xff]   ;;  %v3905_v17 = vld [vmem:[#allocation8 + $0x1f4] ss:$8 sps:$4 sm:$0xff]  }
 0x1ac   : > { %v4942_v20 = vsub.f32 %v4882_v10, %v521_v16  ;;  %v4945_v21 = vsub.f32 %v4887_v12, %v521_v16  ;;  %v626_v22 = vadd.f32 %v618_v5, %v617_v18  ;;  %1043 = vmatprep.subr.bf16.mxu0 %v3897_v0  ;;  %v3903_v16 = vld [vmem:[#allocation8 + $0xd4] ss:$8 sps:$4 sm:$0xff]   ;;  %v3907_v18 = vld [vmem:[#allocation8 + $0xd0] ss:$8 sps:$4 sm:$0xff]  }
 0x1ad   : > { %v4948_v23 = vsub.f32 %v4890_v13, %v522_v6  ;;  %v4951_v24 = vsub.f32 %v4893_v14, %v522_v6  ;;  %v632_v25 = vadd.f32 %v622_v9, %v621_v8  ;;  %v4962_v14 = vld [vmem:[%s4847_s30] sm:$0xff]  ;;  %1295 = vmatpush1.bf16.msra.mxu1 %v3896_v63  ;;  %v3908_v5 = vld [vmem:[#allocation8 + $0x1f0] ss:$8 sps:$4 sm:$0xff]   ;;  %v3912_v8 = vld [vmem:[#allocation8 + $0xf4] ss:$8 sps:$4 sm:$0xff]   ;;  %s3151_s30 = sshll.u32 %s501_s7, 4  ;;  %s5316_s30 = int_to_ptr.vmem [resolvable:$true] %s3151_s30 }
 0x1ae   : > { %627 = vadd.xlane.f32.xlu1 %v626_v22  ;;  %630 = vadd.xlane.f32.xlu0 %v629_v19  ;;  %v527_v10 = vmul.f32 %v4942_v20, %v4942_v20  ;;  %v528_v12 = vmul.f32 %v4945_v21, %v4945_v21  ;;  %v709_v31 = vadd.f32 %v4965_v27, %v4962_v14  ;;  %v3909_v19 = vld [vmem:[#allocation8 + $0xe4] ss:$8 sps:$4 sm:$0xff]   ;;  %v3911_v6 = vld [vmem:[#allocation8 + $0xe0] ss:$8 sps:$4 sm:$0xff]   ;;  %v3914_v9 = vld [vmem:[#allocation8 + $0xf0] ss:$8 sps:$4 sm:$0xff]   ;;  %p4356_p1 = scmp.lt.s32.totalorder %s5316_s30, %s4354_s13 }
 0x1af   : > { %v529_v26 = vmul.f32 %v4948_v23, %v4948_v23  ;;  %v530_v13 = vmul.f32 %v4951_v24, %v4951_v24  ;;  %1296 = vmatprep.subr.bf16.mxu1 %v3899_v1  ;;  %1044 = vmatpush1.bf16.msra.mxu0 %v3901_v4  ;;  %v3917_v22 = vld [vmem:[#allocation8 + $0x204] ss:$8 sps:$4 sm:$0xff]   ;;  %v511_v60 = vld [vmem:[%s5452_s9] ss:$8 sm:$0x3]  ;;  %s4349_s14 = scalar_lea.vmem %s5316_s30, 512 }
 0x1b0   : > { %v531_v28 = vadd.f32 %v528_v12, %v527_v10  ;;  %1045 = vmatprep.subr.bf16.mxu0 %v3903_v16  ;;  %v548_v12 = vlaneseq  ;;  %p4350_p2 = scmp.ne.s32.totalorder %s5316_s30, %s4349_s14  ;;  %p4357_p5 = scmp.lt.s32.totalorder %s4355_s1, %s4349_s14 }
 0x1b1   : > { %v534_v29 = vadd.f32 %v530_v13, %v529_v26  ;;  %1297 = vmatpush1.bf16.msra.mxu1 %v3902_v15 }
 0x1b2   : > { %633 = vadd.xlane.f32.xlu1 %v632_v25  ;;  %532 = vadd.xlane.f32.xlu0 %v531_v28  ;;  %p4351_p3 = pnand %p4350_p2, %p5455_p9  ;;  %p4358_p4 = por %p4357_p5, %p4356_p1 }
 0x1b3   : > { %1298 = vmatprep.subr.bf16.mxu1 %v3905_v17  ;;  %1046 = vmatpush1.bf16.msra.mxu0 %v3907_v18  ;;  %v3345_v17 = vld [vmem:[%s5452_s9 + $0x1] ss:$8 sm:$0x3] }
 0x1b4   : > { %1047 = vmatprep.subr.bf16.mxu0 %v3909_v19  ;;  %p4352_p10 = pneg %p4351_p3 }
 0x1b5   : > { %1299 = vmatpush1.bf16.msra.mxu1 %v3908_v5 }
 0x1b6   : > { %535 = vadd.xlane.f32.xlu1 %v534_v29  ;;  %710 = vadd.xlane.f32.xlu0 %v709_v31  ;;  %p4359_p0 = pnand %p4358_p4, %p4352_p10 }
 0x1b7   : > { %1048 = vmatpush1.bf16.msra.mxu0 %v3911_v6 }
 0x1b8   : > { %1049 = vmatprep.subr.bf16.mxu0 %v3912_v8 }
 0x1ba   : > { %713 = vadd.xlane.f32.xlu1 %v712_v35  ;;  %716 = vadd.xlane.f32.xlu0 %v715_v37  ;;  %v549_v35 = vshrl.u32 %v548_v12, 7 }
 0x1bb   : > { %1050 = vmatpush1.bf16.msra.mxu0 %v3914_v9 }
 0x1bc   : > { %1527 = vmatprep.subr.bf16.mxu0 %v3917_v22  ;;  %v4993_v44 = vsub.s32 0, %v549_v35  ;;  %v4995_v45 = vsub.s32 1, %v549_v35 }
 0x1be   : > { %719 = vadd.xlane.f32.xlu1 %v718_v43  ;;  %v5004_v58 = vrot.slane %v3346_v46, %v4993_v44  ;;  %v663_v59 = vrot.slane %v3346_v46, %v4995_v45  ;;  %v5018_v4 = vrot.slane %v3347_v52, %v4993_v44  ;;  %v682_v15 = vrot.slane %v3347_v52, %v4995_v45 }
 0x1bf   : > { %v555_v22 = vrot.slane %v511_v60, %v4995_v45 }
 0x237   : > { %v625_v25 = vpop.xlane.xlu0 %624 }
 0x238   : > { %v635_v10 = vmul.f32 0.00390625, %v625_v25  ;;  %v566_v25 = vrot.slane %v3345_v17, %v4993_v44 }
 0x23a   : > { %v639_v26 = vadd.f32 1e-05, %v635_v10 }
 0x23b   : > { %v628_v13 = vpop.xlane.xlu1 %627  ;;  %v631_v28 = vpop.xlane.xlu0 %630 }
 0x23c   : > { %4051 = vrsqrt.f32 %v639_v26  ;;  %v636_v29 = vmul.f32 0.00390625, %v628_v13  ;;  %v637_v31 = vmul.f32 0.00390625, %v631_v28 }
 0x23e   : > { %v640_v37 = vadd.f32 1e-05, %v636_v29  ;;  %v641_v38 = vadd.f32 1e-05, %v637_v31  ;;  %v570_v29 = vrot.slane %v3345_v17, %v4995_v45 }
 0x23f   : > { %v634_v39 = vpop.xlane.xlu1 %633  ;;  %v533_v41 = vpop.xlane.xlu0 %532 }
 0x240   : > { %4053 = vrsqrt.f32 %v640_v37  ;;  %v638_v42 = vmul.f32 0.00390625, %v634_v39  ;;  %v537_v43 = vmul.f32 0.00390625, %v533_v41 }
 0x241   : > { %4055 = vrsqrt.f32 %v641_v38 }
 0x242   : > { %v642_v47 = vadd.f32 1e-05, %v638_v42  ;;  %v539_v48 = vadd.f32 1e-05, %v537_v43 }
 0x243   : > { %v536_v49 = vpop.xlane.xlu1 %535  ;;  %v711_v50 = vpop.xlane.xlu0 %710 }
 0x244   : > { %4057 = vrsqrt.f32 %v642_v47  ;;  %v538_v51 = vmul.f32 0.00390625, %v536_v49  ;;  %v721_v53 = vmul.f32 0.00390625, %v711_v50 }
 0x245   : > { %4059 = vrsqrt.f32 %v539_v48 }
 0x246   : > { %v4052_v61 = vpop.eup %4051  ;;  %v540_v62 = vadd.f32 1e-05, %v538_v51  ;;  %v5011_v63 = vsub.f32 %v4962_v14, %v721_v53  ;;  %v5014_v0 = vsub.f32 %v4965_v27, %v721_v53  ;;  %v551_v14 = vrot.slane %v511_v60, %v4993_v44 }
 0x247   : > { %v648_v1 = vmul.f32 %v4052_v61, %v4905_v55  ;;  %v647_v16 = vmul.f32 %v4052_v61, %v4902_v54  ;;  %v714_v18 = vpop.xlane.xlu1 %713  ;;  %v717_v5 = vpop.xlane.xlu0 %716 }
 0x248   : > { %4061 = vrsqrt.f32 %v540_v62  ;;  %v722_v27 = vmul.f32 0.00390625, %v714_v18  ;;  %v723_v19 = vmul.f32 0.00390625, %v717_v5  ;;  %v733_v8 = vmul.f32 %v5011_v63, %v5011_v63 }
 0x249   : > { %v667_v6 = vmul.f32 %v663_v59, %v648_v1  ;;  %v666_v55 = vmul.f32 %v5004_v58, %v647_v16  ;;  %v734_v54 = vmul.f32 %v5014_v0, %v5014_v0 }
 0x24a   : > { %v4054_v9 = vpop.eup %4053  ;;  %v5034_v10 = vsub.f32 %v4968_v30, %v722_v27  ;;  %v5037_v12 = vsub.f32 %v4973_v32, %v722_v27  ;;  %v5043_v35 = vsub.f32 %v4976_v33, %v723_v19  ;;  %v5047_v30 = vsub.f32 %v4979_v34, %v723_v19 }
 0x24b   : > { %v4056_v26 = vpop.eup %4055  ;;  %v650_v13 = vmul.f32 %v4054_v9, %v4925_v3  ;;  %v649_v28 = vmul.f32 %v4054_v9, %v4922_v2  ;;  %v720_v31 = vpop.xlane.xlu1 %719  ;;  %v686_v37 = vadd.f32 %v682_v15, %v667_v6  ;;  %v685_v3 = vadd.f32 %v5018_v4, %v666_v55 }
 0x24c   : > { %v652_v38 = vmul.f32 %v4056_v26, %v4911_v57  ;;  %v724_v39 = vmul.f32 0.00390625, %v720_v31  ;;  %v741_v42 = vadd.f32 %v734_v54, %v733_v8  ;;  %v735_v33 = vmul.f32 %v5034_v10, %v5034_v10 }
 0x24d   : > { %v669_v32 = vmul.f32 %v663_v59, %v650_v13  ;;  %v668_v41 = vmul.f32 %v5004_v58, %v649_v28  ;;  %v736_v57 = vmul.f32 %v5037_v12, %v5037_v12  ;;  %v651_v52 = vmul.f32 %v4056_v26, %v4908_v56  ;;  %v3915_v28 = vld [vmem:[#allocation8 + $0x200] ss:$8 sps:$4 sm:$0xff]  }
 0x24e   : > { %v4058_v2 = vpop.eup %4057  ;;  %v671_v43 = vmul.f32 %v663_v59, %v652_v38  ;;  %v5052_v46 = vsub.f32 %v4984_v36, %v724_v39  ;;  %742 = vadd.xlane.f32.xlu0 %v741_v42  ;;  %v5065_v53 = vsub.f32 %v4989_v40, %v724_v39  ;;  %v3918_v38 = vld [vmem:[#allocation8 + $0x210] ss:$8 sps:$4 sm:$0xff]   ;;  %v3923_v39 = vld [vmem:[#allocation8 + $0x224] ss:$8 sps:$4 sm:$0xff]  }
 0x24f   : > { %v4060_v47 = vpop.eup %4059  ;;  %v688_v34 = vadd.f32 %v682_v15, %v669_v32  ;;  %v687_v48 = vadd.f32 %v5018_v4, %v668_v41  ;;  %v654_v49 = vmul.f32 %v4058_v2, %v4931_v11  ;;  %v653_v50 = vmul.f32 %v4058_v2, %v4928_v7  ;;  %v3929_v32 = vld [vmem:[#allocation8 + $0x244] ss:$8 sps:$4 sm:$0xff]   ;;  %v3927_v41 = vld [vmem:[#allocation8 + $0x240] ss:$8 sps:$4 sm:$0xff]   ;;  %v3930_v42 = vld [vmem:[#allocation8 + $0x250] ss:$8 sps:$4 sm:$0xff]  }
 0x250   : > { %v544_v51 = vmul.f32 %v4060_v47, %v4945_v21  ;;  %v543_v36 = vmul.f32 %v4060_v47, %v4942_v20  ;;  %v690_v1 = vadd.f32 %v682_v15, %v671_v43  ;;  %v744_v18 = vadd.f32 %v736_v57, %v735_v33  ;;  %v3935_v2 = vld [vmem:[#allocation8 + $0x264] ss:$8 sps:$4 sm:$0xff]   ;;  %v3933_v43 = vld [vmem:[#allocation8 + $0x260] ss:$8 sps:$4 sm:$0xff]   ;;  %v3938_v33 = vld [vmem:[#allocation8 + $0x274] ss:$8 sps:$4 sm:$0xff]  }
 0x251   : > { %v694_v60 = vpack.c.bf16 %v688_v34, %v686_v37  ;;  %v693_v61 = vpack.c.bf16 %v687_v48, %v685_v3  ;;  %v673_v62 = vmul.f32 %v663_v59, %v654_v49  ;;  %v672_v11 = vmul.f32 %v5004_v58, %v653_v50  ;;  %v3920_v37 = vld [vmem:[#allocation8 + $0x214] ss:$8 sps:$4 sm:$0xff]   ;;  %v3936_v57 = vld [vmem:[#allocation8 + $0x270] ss:$8 sps:$4 sm:$0xff]   ;;  %v3941_v47 = vld [vmem:[#allocation8 + $0x284] ss:$8 sps:$4 sm:$0xff]  }
 0x252   : > { %v4062_v16 = vpop.eup %4061  ;;  %v559_v17 = vmul.f32 %v555_v22, %v544_v51  ;;  %v739_v7 = vmul.f32 %v5052_v46, %v5052_v46  ;;  %v558_v40 = vmul.f32 %v551_v14, %v543_v36  ;;  %v670_v5 = vmul.f32 %v5004_v58, %v651_v52  ;;  %745 = vadd.xlane.f32.xlu1 %v744_v18  ;;  %v3932_v3 = vld [vmem:[#allocation8 + $0x254] ss:$8 sps:$4 sm:$0xff]   ;;  %v3939_v34 = vld [vmem:[#allocation8 + $0x280] ss:$8 sps:$4 sm:$0xff]   ;;  %v3942_v49 = vld [vmem:[#allocation8 + $0x290] ss:$8 sps:$4 sm:$0xff]  }
 0x253   : > { %1300 = vmatprep.mubr.bf16.mxu1 %v694_v60  ;;  %v692_v21 = vadd.f32 %v682_v15, %v673_v62  ;;  %v546_v20 = vmul.f32 %v4062_v16, %v4951_v24  ;;  %v545_v56 = vmul.f32 %v4062_v16, %v4948_v23  ;;  %v740_v59 = vmul.f32 %v5065_v53, %v5065_v53  ;;  %v3944_v48 = vld [vmem:[#allocation8 + $0x294] ss:$8 sps:$4 sm:$0xff]   ;;  %v3947_v50 = vld [vmem:[#allocation8 + $0x2a4] ss:$8 sps:$4 sm:$0xff]   ;;  %v3945_v51 = vld [vmem:[#allocation8 + $0x2a0] ss:$8 sps:$4 sm:$0xff]  }
 0x254   : > { %1301 = vmatmul.mubr.bf16.vlgmr.msra.gmra.mrb[0].mxu1 %v693_v61  ;;  %v691_v55 = vadd.f32 %v5018_v4, %v672_v11  ;;  %v737_v15 = vmul.f32 %v5043_v35, %v5043_v35  ;;  %v738_v23 = vmul.f32 %v5047_v30, %v5047_v30  ;;  %v574_v24 = vadd.f32 %v570_v29, %v559_v17  ;;  %v3950_v36 = vld [vmem:[#allocation8 + $0x2b4] ss:$8 sps:$4 sm:$0xff]   ;;  %v3948_v52 = vld [vmem:[#allocation8 + $0x2b0] ss:$8 sps:$4 sm:$0xff]   ;;  %v3953_v60 = vld [vmem:[#allocation8 + $0x2c4] ss:$8 sps:$4 sm:$0xff]  }
 0x255   : > { %v696_v27 = vpack.c.bf16 %v692_v21, %v690_v1  ;;  %v561_v19 = vmul.f32 %v555_v22, %v546_v20  ;;  %v560_v6 = vmul.f32 %v551_v14, %v545_v56  ;;  %v750_v8 = vadd.f32 %v740_v59, %v739_v7  ;;  %v3951_v61 = vld [vmem:[#allocation8 + $0x2c0] ss:$8 sps:$4 sm:$0xff]   ;;  %v3956_v62 = vld [vmem:[#allocation8 + $0x2d4] ss:$8 sps:$4 sm:$0xff]   ;;  %v3954_v1 = vld [vmem:[#allocation8 + $0x2d0] ss:$8 sps:$4 sm:$0xff]  }
 0x256   : > { %v573_v58 = vadd.f32 %v566_v25, %v558_v40  ;;  %v689_v26 = vadd.f32 %v5018_v4, %v670_v5  ;;  %v747_v13 = vadd.f32 %v738_v23, %v737_v15  ;;  %v3924_v4 = vld [vmem:[#allocation8 + $0x230] ss:$8 sps:$4 sm:$0xff]   ;;  %v3959_v16 = vld [vmem:[#allocation8 + $0x2e4] ss:$8 sps:$4 sm:$0xff]   ;;  %v3957_v17 = vld [vmem:[#allocation8 + $0x2e0] ss:$8 sps:$4 sm:$0xff]  }
 0x257   : > { %1310 = vmatprep.mubr.bf16.mxu1 %v696_v27  ;;  %v576_v54 = vadd.f32 %v570_v29, %v561_v19  ;;  %v575_v9 = vadd.f32 %v566_v25, %v560_v6  ;;  %751 = vadd.xlane.f32.xlu1 %v750_v8  ;;  %v3921_v29 = vld [vmem:[#allocation8 + $0x220] ss:$8 sps:$4 sm:$0xff]   ;;  %v3926_v25 = vld [vmem:[#allocation8 + $0x234] ss:$8 sps:$4 sm:$0xff]   ;;  %v3960_v18 = vld [vmem:[#allocation8 + $0x2f0] ss:$8 sps:$4 sm:$0xff]  }
 0x258   : > { %v695_v31 = vpack.c.bf16 %v691_v55, %v689_v26  ;;  %748 = vadd.xlane.f32.xlu0 %v747_v13  ;;  %v3962_v11 = vld [vmem:[#allocation8 + $0x2f4] ss:$8 sps:$4 sm:$0xff]   ;;  %v4447_v7 = vmov 0.0   ;;  %v3348_v15 = vld [vmem:[%s5452_s9 + $0x4] ss:$8 sm:$0x3] }
 0x259   : > { %v578_v22 = vpack.c.bf16 %v576_v54, %v574_v24  ;;  %v577_v14 = vpack.c.bf16 %v575_v9, %v573_v58  ;;  %3594 = vmatprep.subr.bf16.mxu1 %v4447_v7  ;;  %v777_v54 = vrot.slane %v3348_v15, %v4993_v44  ;;  %v781_v58 = vrot.slane %v3348_v15, %v4995_v45  ;;  %v3349_v26 = vld [vmem:[%s5452_s9 + $0x5] ss:$8 sm:$0x3] }
 0x25b   : > { %1051 = vmatprep.mubr.bf16.mxu0 %v578_v22 }
 0x25c   : > { %1052 = vmatmul.mubr.bf16.vlgmr.msra.gmra.mrb[0].mxu0 %v577_v14  ;;  %1311 = vmatmul.mubr.bf16.gmra.mrb[4].mxu1 %v695_v31  ;;  %v796_v14 = vrot.slane %v3349_v26, %v4993_v44 }
 0x25d   : > { %1528 = vmatpush1.bf16.msra.mxu0 %v3915_v28  ;;  %3596 = vmatprep.mubr.msk.bf16.mxu1 %vm4448_vm0, %v4447_v7  ;;  %v800_v28 = vrot.slane %v3349_v26, %v4995_v45 }
 0x25e   : > { %1529 = vmatprep.subr.bf16.mxu0 %v3920_v37 }
 0x261   : > { %1530 = vmatpush1.bf16.msra.mxu0 %v3918_v38 }
 0x262   : > { %1531 = vmatprep.subr.bf16.mxu0 %v3923_v39 }
 0x265   : > { %1532 = vmatpush1.bf16.msra.mxu0 %v3921_v29 }
 0x266   : > { %1533 = vmatprep.subr.bf16.mxu0 %v3926_v25 }
 0x269   : > { %1534 = vmatpush1.bf16.msra.mxu0 %v3924_v4 }
 0x26a   : > { %1535 = vmatprep.subr.bf16.mxu0 %v3929_v32 }
 0x26d   : > { %1536 = vmatpush1.bf16.msra.mxu0 %v3927_v41 }
 0x26e   : > { %1537 = vmatprep.subr.bf16.mxu0 %v3932_v3 }
 0x271   : > { %1538 = vmatpush1.bf16.msra.mxu0 %v3930_v42 }
 0x272   : > { %1539 = vmatprep.subr.bf16.mxu0 %v3935_v2 }
 0x275   : > { %1540 = vmatpush1.bf16.msra.mxu0 %v3933_v43 }
 0x276   : > { %1541 = vmatprep.subr.bf16.mxu0 %v3938_v33 }
 0x279   : > { %1542 = vmatpush1.bf16.msra.mxu0 %v3936_v57 }
 0x27a   : > { %1543 = vmatprep.subr.bf16.mxu0 %v3941_v47 }
 0x27d   : > { %1544 = vmatpush1.bf16.msra.mxu0 %v3939_v34 }
 0x27e   : > { %1545 = vmatprep.subr.bf16.mxu0 %v3944_v48 }
 0x281   : > { %1546 = vmatpush1.bf16.msra.mxu0 %v3942_v49 }
 0x282   : > { %1547 = vmatprep.subr.bf16.mxu0 %v3947_v50 }
 0x285   : > { %1548 = vmatpush1.bf16.msra.mxu0 %v3945_v51 }
 0x286   : > { %1549 = vmatprep.subr.bf16.mxu0 %v3950_v36 }
 0x289   : > { %1550 = vmatpush1.bf16.msra.mxu0 %v3948_v52 }
 0x28a   : > { %1551 = vmatprep.subr.bf16.mxu0 %v3953_v60 }
 0x28d   : > { %1552 = vmatpush1.bf16.msra.mxu0 %v3951_v61 }
 0x28e   : > { %1553 = vmatprep.subr.bf16.mxu0 %v3956_v62 }
 0x291   : > { %1554 = vmatpush1.bf16.msra.mxu0 %v3954_v1  ;;  %v847_v1 = vld [vmem:[#allocation14] ss:$8 sm:$0x3] }
 0x292   : > { %1555 = vmatprep.subr.bf16.mxu0 %v3959_v16 }
 0x295   : > { %1556 = vmatpush1.bf16.msra.mxu0 %v3957_v17 }
 0x296   : > { %1557 = vmatprep.subr.bf16.mxu0 %v3962_v11 }
 0x299   : > { %1558 = vmatpush1.bf16.msra.mxu0 %v3960_v18 }
 0x29a   : > { %3642 = vmatprep.subr.bf16.mxu0 %v4447_v7 }
 0x2db   : > { %v743_v21 = vpop.xlane.xlu0 %742 }
 0x2dc   : > { %v753_v20 = vmul.f32 0.00390625, %v743_v21 }
 0x2de   : > { %v757_v56 = vadd.f32 1e-05, %v753_v20 }
 0x2df   : > { %v746_v40 = vpop.xlane.xlu1 %745 }
 0x2e0   : > { %4063 = vrsqrt.f32 %v757_v56  ;;  %v754_v5 = vmul.f32 0.00390625, %v746_v40  ;;  %v852_v56 = vrot.slane %v847_v1, %v4993_v44 }
 0x2e2   : > { %v758_v59 = vadd.f32 1e-05, %v754_v5  ;;  %v856_v5 = vrot.slane %v847_v1, %v4995_v45 }
 0x2e4   : > { %v752_v27 = vpop.xlane.xlu1 %751  ;;  %4065 = vrsqrt.f32 %v758_v59 }
 0x2e5   : > { %v756_v19 = vmul.f32 0.00390625, %v752_v27  ;;  %v749_v6 = vpop.xlane.xlu0 %748 }
 0x2e6   : > { %v755_v8 = vmul.f32 0.00390625, %v749_v6 }
 0x2e7   : > { %v760_v55 = vadd.f32 1e-05, %v756_v19 }
 0x2e8   : > { %v759_v23 = vadd.f32 1e-05, %v755_v8 }
 0x2e9   : > { %4067 = vrsqrt.f32 %v760_v55 }
 0x2ea   : > { %v4064_v24 = vpop.eup %4063  ;;  %4069 = vrsqrt.f32 %v759_v23 }
 0x2eb   : > { %v765_v9 = vmul.f32 %v4064_v24, %v5011_v63  ;;  %v766_v13 = vmul.f32 %v4064_v24, %v5014_v0 }
 0x2ed   : > { %v785_v22 = vmul.f32 %v781_v58, %v766_v13  ;;  %v784_v31 = vmul.f32 %v777_v54, %v765_v9 }
 0x2ee   : > { %v4066_v37 = vpop.eup %4065 }
 0x2ef   : > { %v767_v38 = vmul.f32 %v4066_v37, %v5034_v10  ;;  %v768_v39 = vmul.f32 %v4066_v37, %v5037_v12  ;;  %v804_v63 = vadd.f32 %v800_v28, %v785_v22  ;;  %v803_v4 = vadd.f32 %v796_v14, %v784_v31 }
 0x2f1   : > { %v787_v29 = vmul.f32 %v781_v58, %v768_v39  ;;  %v786_v25 = vmul.f32 %v777_v54, %v767_v38 }
 0x2f3   : > { %v4068_v32 = vpop.eup %4067  ;;  %v806_v41 = vadd.f32 %v800_v28, %v787_v29  ;;  %v805_v3 = vadd.f32 %v796_v14, %v786_v25 }
 0x2f4   : > { %v772_v0 = vmul.f32 %v4068_v32, %v5065_v53  ;;  %v771_v42 = vmul.f32 %v4068_v32, %v5052_v46  ;;  %v4070_v2 = vpop.eup %4069 }
 0x2f5   : > { %v812_v43 = vpack.c.bf16 %v806_v41, %v804_v63  ;;  %v811_v33 = vpack.c.bf16 %v805_v3, %v803_v4  ;;  %v770_v57 = vmul.f32 %v4070_v2, %v5047_v30  ;;  %v769_v10 = vmul.f32 %v4070_v2, %v5043_v35  ;;  %v1096_v30 = vld [vmem:[#allocation14 + $0x1] ss:$8 sm:$0x3]  ;;  %v1355_v4 = vld [vmem:[#allocation14 + $0x2] ss:$8 sm:$0x3] }
 0x2f6   : > { %v791_v47 = vmul.f32 %v781_v58, %v772_v0  ;;  %v790_v12 = vmul.f32 %v777_v54, %v771_v42  ;;  %v1101_v46 = vrot.slane %v1096_v30, %v4993_v44  ;;  %v1105_v60 = vrot.slane %v1096_v30, %v4995_v45 }
 0x2f7   : > { %1559 = vmatprep.mubr.bf16.mxu0 %v812_v43  ;;  %v789_v34 = vmul.f32 %v781_v58, %v770_v57  ;;  %v788_v49 = vmul.f32 %v777_v54, %v769_v10  ;;  %v1360_v32 = vrot.slane %v1355_v4, %v4993_v44  ;;  %v1364_v41 = vrot.slane %v1355_v4, %v4995_v45 }
 0x2f8   : > { %v810_v48 = vadd.f32 %v800_v28, %v791_v47  ;;  %1560 = vmatmul.mubr.bf16.vlgmr.msra.gmra.mrb[4].mxu0 %v811_v33  ;;  %v809_v50 = vadd.f32 %v796_v14, %v790_v12 }
 0x2f9   : > { %v808_v51 = vadd.f32 %v800_v28, %v789_v34  ;;  %v807_v36 = vadd.f32 %v796_v14, %v788_v49 }
 0x2fb   : > { %v814_v53 = vpack.c.bf16 %v810_v48, %v808_v51  ;;  %v813_v52 = vpack.c.bf16 %v809_v50, %v807_v36 }
 0x2fd   : > { %1569 = vmatprep.mubr.bf16.mxu0 %v814_v53 }
 0x300   : > { %1570 = vmatmul.mubr.bf16.gmra.mrb[8].mxu0 %v813_v52 }
 0x301   : > { %3644 = vmatprep.mubr.msk.bf16.mxu0 %vm4448_vm0, %v4447_v7 }
 0x327   : > { %v1302_v35 = vpop.f32.mrb[0].mxu1 }
 0x328   : > { %v1304_v61 = vpop.f32.mrb[1].mxu1  ;;  %v1303_v16 = vadd.f32 %v1302_v35, %v1101_v46 }
 0x329   : > { %v1306_v62 = vpop.f32.mrb[2].mxu1  ;;  %v1305_v18 = vadd.f32 %v1304_v61, %v1105_v60 }
 0x32a   : > { %v1307_v17 = vadd.f32 %v1306_v62, %v1101_v46  ;;  %v1308_v11 = vpop.f32.mrb[3].mxu1 }
 0x32b   : > { %v1309_v21 = vadd.f32 %v1308_v11, %v1105_v60 }
 0x32c   : > { %v5107_v20 = vpack.c.bf16 %v1307_v17, %v1303_v16 }
 0x32d   : > { %v5110_v40 = vpack.c.bf16 %v1309_v21, %v1305_v18 }
 0x32e   : > { %v1591_v59 = vsel %vm1586_vm1, %v5107_v20, 0 }
 0x32f   : > { %v1053_v27 = vpop.f32.mrb[0].mxu0  ;;  %v1312_v19 = vpop.f32.mrb[4].mxu1  ;;  %3595 = vmatpush3.bf16.xpose.msra.mxu1 %v1591_v59  ;;  %v2026_v6 = vsel %vm1586_vm1, %v5110_v40, 0 }
 0x330   : > { %v1054_v55 = vadd.f32 %v1053_v27, %v852_v56  ;;  %v1055_v8 = vpop.f32.mrb[1].mxu0  ;;  %v1314_v15 = vpop.f32.mrb[5].mxu1  ;;  %3643 = vmatpush3.bf16.xpose.msra.mxu0 %v2026_v6  ;;  %3600 = vmatprep.subr.bf16.mxu1 %v4447_v7  ;;  %v1313_v9 = vadd.f32 %v1312_v19, %v1101_v46 }
 0x331   : > { %v1056_v23 = vadd.f32 %v1055_v8, %v856_v5  ;;  %v1315_v24 = vadd.f32 %v1314_v15, %v1105_v60  ;;  %v1057_v54 = vpop.f32.mrb[2].mxu0  ;;  %v1316_v58 = vpop.f32.mrb[6].mxu1  ;;  %3654 = vmatprep.subr.bf16.mxu0 %v4447_v7 }
 0x332   : > { %v1317_v26 = vadd.f32 %v1316_v58, %v1101_v46  ;;  %v1059_v13 = vpop.f32.mrb[3].mxu0  ;;  %v1318_v22 = vpop.f32.mrb[7].mxu1  ;;  %v5121_v31 = vpack.c.bf16 %v1054_v55, %v1054_v55  ;;  %v1058_v63 = vadd.f32 %v1057_v54, %v852_v56 }
 0x333   : > { %v5119_v14 = vadd.f32 %v1059_v13, %v856_v5  ;;  %v1319_v28 = vadd.f32 %v1318_v22, %v1105_v60  ;;  %v5125_v38 = vpack.c.bf16 %v1056_v23, %v1056_v23 }
 0x334   : > { %v5123_v37 = vpack.c.bf16 %v1317_v26, %v1313_v9  ;;  %v5140_v25 = vpack.c.bf16 %v1058_v63, %v1058_v63 }
 0x335   : > { %v5127_v39 = vpack.c.bf16 %v1319_v28, %v1315_v24 }
 0x336   : > { %3597 = vmatmul.mubr.msk.bf16.vlgmr.msra.gmra.mrb[8].mxu1 %vm1586_vm1, %v5121_v31  ;;  %v1637_v29 = vsel %vm1586_vm1, %v5123_v37, 0 }
 0x337   : > { %3601 = vmatpush3.bf16.xpose.msra.mxu1 %v1637_v29  ;;  %3645 = vmatmul.mubr.msk.bf16.vlgmr.msra.gmra.mrb[12].mxu0 %vm1586_vm1, %v5125_v38 }
 0x338   : > { %3602 = vmatprep.mubr.msk.bf16.mxu1 %vm4448_vm0, %v4447_v7  ;;  %3606 = vmatprep.subr.bf16.mxu1 %v4447_v7 }
 0x339   : > { %3656 = vmatprep.mubr.msk.bf16.mxu0 %vm4448_vm0, %v4447_v7 }
 0x33e   : > { %3603 = vmatmul.mubr.msk.bf16.vlgmr.msra.gmra.mrb[12].mxu1 %vm1586_vm1, %v5140_v25 }
 0x33f   : > { %3608 = vmatprep.mubr.msk.bf16.mxu1 %vm4448_vm0, %v4447_v7 }
 0x3cb   : > { %v1561_v3 = vpop.f32.mrb[4].mxu0 }
 0x3cc   : > { %v1562_v0 = vadd.f32 %v1561_v3, %v1360_v32  ;;  %v1563_v42 = vpop.f32.mrb[5].mxu0 }
 0x3cd   : > { %v1564_v2 = vadd.f32 %v1563_v42, %v1364_v41  ;;  %v1565_v43 = vpop.f32.mrb[6].mxu0 }
 0x3ce   : > { %v1566_v33 = vadd.f32 %v1565_v43, %v1360_v32  ;;  %v1567_v57 = vpop.f32.mrb[7].mxu0 }
 0x3cf   : > { %v1568_v47 = vadd.f32 %v1567_v57, %v1364_v41 }
 0x3d0   : > { %v5148_v10 = vpack.c.bf16 %v1566_v33, %v1562_v0 }
 0x3d1   : > { %v5150_v12 = vpack.c.bf16 %v1568_v47, %v1564_v2 }
 0x3d2   : > { %3607 = vmatpush3.bf16.msra.mxu1 %v5148_v10 }
 0x3d3   : > { %v1571_v34 = vpop.f32.mrb[8].mxu0  ;;  %3655 = vmatpush3.bf16.msra.mxu0 %v5150_v12  ;;  %3612 = vmatprep.subr.bf16.mxu1 %v4447_v7 }
 0x3d4   : > { %v1572_v48 = vadd.f32 %v1571_v34, %v1360_v32  ;;  %v1573_v49 = vpop.f32.mrb[9].mxu0  ;;  %3666 = vmatprep.subr.bf16.mxu0 %v4447_v7 }
 0x3d5   : > { %v1574_v50 = vadd.f32 %v1573_v49, %v1364_v41  ;;  %v1575_v51 = vpop.f32.mrb[10].mxu0 }
 0x3d6   : > { %v1576_v36 = vadd.f32 %v1575_v51, %v1360_v32  ;;  %v1577_v53 = vpop.f32.mrb[11].mxu0 }
 0x3d7   : > { %v1578_v52 = vadd.f32 %v1577_v53, %v1364_v41 }
 0x3d8   : > { %v5156_v30 = vpack.c.bf16 %v1576_v36, %v1572_v48 }
 0x3d9   : > { %v5158_v46 = vpack.c.bf16 %v1578_v52, %v1574_v50 }
 0x409   : > { %v1627_v35 = vpop.f32.mrb[8].mxu1 }
 0x40a   : > { %v1679_v60 = vmul.f32 0.125, %v1627_v35  ;;  %v3598_v61 = vpop.f32.mrb[9].mxu1  ;;  %v5160_v62 = vpop.f32.mrb[12].mxu0 }
 0x40b   : > { %v1630_v1 = vpop.f32.mrb[10].mxu1  ;;  %v3646_v16 = vpop.f32.mrb[13].mxu0 }
 0x40c   : > { %v3599_v17 = vpop.f32.mrb[11].mxu1  ;;  %v2065_v11 = vpop.f32.mrb[14].mxu0  ;;  %v1682_v18 = vsel %vm1681_vm2, %v1679_v60, -inf }
 0x40d   : > { %1683 = vmax.xlane.f32.xlu0 %v1682_v18  ;;  %v3647_v21 = vpop.f32.mrb[15].mxu0  ;;  %v2114_v18 = vmul.f32 0.125, %v5160_v62 }
 0x40f   : > { %v2116_v21 = vsel %vm1681_vm2, %v2114_v18, -inf }
 0x411   : > { %v1673_v56 = vpop.f32.mrb[12].mxu1 }
 0x412   : > { %v1680_v5 = vmul.f32 0.125, %v1673_v56  ;;  %v3604_v59 = vpop.f32.mrb[13].mxu1 }
 0x413   : > { %v1676_v27 = vpop.f32.mrb[14].mxu1 }
 0x414   : > { %v3605_v19 = vpop.f32.mrb[15].mxu1  ;;  %v1685_v6 = vsel %vm1681_vm2, %v1680_v5, -inf }
 0x415   : > { %1686 = vmax.xlane.f32.xlu1 %v1685_v6 }
 0x49a   : > { %v1684_v55 = vpop.xlane.xlu0 %1683 }
 0x49b   : > { %v1688_v8 = vsub.f32 %v1679_v60, %v1684_v55 }
 0x49d   : > { %v1690_v15 = vmul.f32 1.442695, %v1688_v8 }
 0x49f   : > { %4071 = vpow2.f32 %v1690_v15 }
 0x4a2   : > { %v1687_v23 = vpop.xlane.xlu1 %1686 }
 0x4a3   : > { %v1689_v24 = vsub.f32 %v1680_v5, %v1687_v23 }
 0x4a5   : > { %v1692_v54 = vmul.f32 1.442695, %v1689_v24 }
 0x4a7   : > { %4073 = vpow2.f32 %v1692_v54 }
 0x4a9   : > { %v4072_v58 = vpop.eup %4071 }
 0x4aa   : > { %v1694_v9 = vsel %vm1681_vm2, %v4072_v58, 0.0 }
 0x4ab   : > { %1695 = vadd.xlane.f32.xlu0 %v1694_v9 }
 0x4b1   : > { %v4074_v26 = vpop.eup %4073 }
 0x4b2   : > { %v1697_v13 = vsel %vm1681_vm2, %v4074_v26, 0.0 }
 0x4b3   : > { %1698 = vadd.xlane.f32.xlu1 %v1697_v13 }
 0x4c1   : > { %1796 = vrot.lane.b32.xlu0 %v5107_v20, %s4449_s24 }
 0x4c4   : > { %1793 = vrot.lane.b32.xlu1 %v5121_v31, %s4449_s24 }
 0x4c8   : > { %1848 = vrot.lane.b32.xlu1 %v5123_v37, %s4449_s24 }
 0x4cc   : > { %1845 = vrot.lane.b32.xlu1 %v5140_v25, %s4449_s24 }
 0x538   : > { %v1696_v22 = vpop.xlane.xlu0 %1695 }
 0x539   : > { %4075 = vrcp.f32 %v1696_v22 }
 0x53c   : > { %v1797_v37 = vpop.permute.xlu0 %1796 }
 0x53d   : > { %v1802_v41 = vsel %vm1586_vm1, %v1797_v37, 0 }
 0x540   : > { %v1699_v28 = vpop.xlane.xlu1 %1698 }
 0x541   : > { %4077 = vrcp.f32 %v1699_v28  ;;  %v2072_v28 = vsel %vm1586_vm1, %v5127_v39, 0 }
 0x543   : > { %v4076_v29 = vpop.eup %4075 }
 0x544   : > { %v1702_v63 = vmul.f32 %v4076_v29, %v4072_v58  ;;  %v1794_v32 = vpop.permute.xlu1 %1793  ;;  %v2017_v29 = vpack.c.bf16 %v5119_v14, %v5119_v14 }
 0x546   : > { %v1704_v4 = vpack.c.bf16 %v1702_v63, %v1702_v63 }
 0x548   : > { %3609 = vmatmul.mubr.msk.bf16.vlgmr.msra.gmra.mrb[16].mxu1 %vm1681_vm2, %v1704_v4  ;;  %v1849_v3 = vpop.permute.xlu1 %1848 }
 0x549   : > { %3613 = vmatpush3.bf16.msra.mxu1 %v5156_v30  ;;  %3614 = vmatprep.mubr.msk.bf16.mxu1 %vm4448_vm0, %v4447_v7  ;;  %v1854_v0 = vsel %vm1586_vm1, %v1849_v3, 0 }
 0x54a   : > { %3618 = vmatprep.subr.bf16.mxu1 %v4447_v7 }
 0x54b   : > { %v4078_v20 = vpop.eup %4077 }
 0x54c   : > { %v1703_v31 = vmul.f32 %v4078_v20, %v4074_v26  ;;  %v1846_v42 = vpop.permute.xlu1 %1845 }
 0x54e   : > { %v1705_v25 = vpack.c.bf16 %v1703_v31, %v1703_v31 }
 0x550   : > { %3615 = vmatmul.mubr.msk.bf16.vlgmr.msra.gmra.mrb[20].mxu1 %vm1681_vm2, %v1705_v25 }
 0x551   : > { %3620 = vmatprep.mubr.msk.bf16.mxu1 %vm4448_vm0, %v4447_v7 }
 0x552   : > { %3619 = vmatpush3.bf16.xpose.msra.mxu1 %v1802_v41 }
 0x553   : > { %3624 = vmatprep.subr.bf16.mxu1 %v4447_v7 }
 0x559   : > { %3621 = vmatmul.mubr.msk.bf16.vlgmr.msra.gmra.mrb[24].mxu1 %vm1586_vm1, %v1794_v32 }
 0x55a   : > { %3625 = vmatpush3.bf16.xpose.msra.mxu1 %v1854_v0  ;;  %3626 = vmatprep.mubr.msk.bf16.mxu1 %vm4448_vm0, %v4447_v7 }
 0x55b   : > { %3630 = vmatprep.subr.bf16.mxu1 %v4447_v7 }
 0x561   : > { %3627 = vmatmul.mubr.msk.bf16.vlgmr.msra.gmra.mrb[28].mxu1 %vm1586_vm1, %v1846_v42 }
 0x562   : > { %3632 = vmatprep.mubr.msk.bf16.mxu1 %vm4448_vm0, %v4447_v7 }
 0x61b   : > { %v5192_v2 = vpop.f32.mrb[16].mxu1 }
 0x61c   : > { %v3610_v43 = vpop.f32.mrb[17].mxu1 }
 0x61d   : > { %v1746_v33 = vpop.f32.mrb[18].mxu1 }
 0x61e   : > { %v3611_v57 = vpop.f32.mrb[19].mxu1 }
 0x623   : > { %v5194_v47 = vpop.f32.mrb[20].mxu1 }
 0x624   : > { %v3616_v34 = vpop.f32.mrb[21].mxu1 }
 0x625   : > { %v1789_v48 = vpop.f32.mrb[22].mxu1 }
 0x626   : > { %v3617_v49 = vpop.f32.mrb[23].mxu1 }
 0x62c   : > { %v1838_v50 = vpop.f32.mrb[24].mxu1 }
 0x62d   : > { %v1896_v51 = vmul.f32 0.125, %v1838_v50  ;;  %v3622_v36 = vpop.f32.mrb[25].mxu1 }
 0x62e   : > { %v1841_v53 = vpop.f32.mrb[26].mxu1 }
 0x62f   : > { %v3623_v52 = vpop.f32.mrb[27].mxu1  ;;  %v1898_v35 = vsel %vm1681_vm2, %v1896_v51, -inf }
 0x630   : > { %1899 = vmax.xlane.f32.xlu0 %v1898_v35 }
 0x634   : > { %v1890_v60 = vpop.f32.mrb[28].mxu1 }
 0x635   : > { %v1897_v61 = vmul.f32 0.125, %v1890_v60  ;;  %v3628_v1 = vpop.f32.mrb[29].mxu1 }
 0x636   : > { %v1893_v16 = vpop.f32.mrb[30].mxu1 }
 0x637   : > { %v3629_v17 = vpop.f32.mrb[31].mxu1  ;;  %v1901_v11 = vsel %vm1681_vm2, %v1897_v61, -inf }
 0x638   : > { %1902 = vmax.xlane.f32.xlu1 %v1901_v11 }
 0x649   : > { %1970 = vrot.lane.b32.xlu1 %v5156_v30, %s4449_s24 }
 0x66d   : > { %2117 = vmax.xlane.f32.xlu1 %v2116_v21 }
 0x67e   : > { %2282 = vrot.lane.b32.xlu1 %v5127_v39, %s4449_s24 }
 0x6bd   : > { %v1900_v56 = vpop.xlane.xlu0 %1899 }
 0x6be   : > { %v1904_v5 = vsub.f32 %v1896_v51, %v1900_v56 }
 0x6c0   : > { %v1906_v59 = vmul.f32 1.442695, %v1904_v5 }
 0x6c2   : > { %4079 = vpow2.f32 %v1906_v59 }
 0x6c5   : > { %v1903_v27 = vpop.xlane.xlu1 %1902 }
 0x6c6   : > { %v1905_v19 = vsub.f32 %v1897_v61, %v1903_v27 }
 0x6c8   : > { %v1908_v6 = vmul.f32 1.442695, %v1905_v19 }
 0x6c9   : > { %v1971_v26 = vpop.permute.xlu1 %1970 }
 0x6ca   : > { %4081 = vpow2.f32 %v1908_v6 }
 0x6cc   : > { %v4080_v55 = vpop.eup %4079 }
 0x6cd   : > { %v1910_v8 = vsel %vm1681_vm2, %v4080_v55, 0.0 }
 0x6ce   : > { %1911 = vadd.xlane.f32.xlu0 %v1910_v8 }
 0x6d4   : > { %v4082_v30 = vpop.eup %4081 }
 0x6d5   : > { %v1913_v62 = vsel %vm1681_vm2, %v4082_v30, 0.0 }
 0x6d6   : > { %1914 = vadd.xlane.f32.xlu0 %v1913_v62 }
 0x6ec   : > { %1923 = vrot.lane.b32.xlu0 %v5148_v10, %s4449_s24 }
 0x6fa   : > { %v2118_v63 = vpop.xlane.xlu1 %2117 }
 0x6fb   : > { %v2122_v31 = vsub.f32 %v2114_v18, %v2118_v63 }
 0x6fd   : > { %v2124_v25 = vmul.f32 1.442695, %v2122_v31 }
 0x75b   : > { %v1912_v15 = vpop.xlane.xlu0 %1911 }
 0x75c   : > { %4083 = vrcp.f32 %v1912_v15 }
 0x763   : > { %v1915_v23 = vpop.xlane.xlu0 %1914 }
 0x764   : > { %4085 = vrcp.f32 %v1915_v23 }
 0x765   : > { %4087 = vpow2.f32 %v2124_v25 }
 0x766   : > { %v4084_v24 = vpop.eup %4083 }
 0x767   : > { %v1918_v54 = vmul.f32 %v4084_v24, %v4080_v55  ;;  %v1924_v58 = vpop.permute.xlu0 %1923 }
 0x768   : > { %3631 = vmatpush3.bf16.msra.mxu1 %v1924_v58 }
 0x769   : > { %v1920_v9 = vpack.c.bf16 %v1918_v54, %v1918_v54  ;;  %3636 = vmatprep.subr.bf16.mxu1 %v4447_v7 }
 0x76b   : > { %3633 = vmatmul.mubr.msk.bf16.vlgmr.msra.gmra.mrb[32].mxu1 %vm1681_vm2, %v1920_v9 }
 0x76c   : > { %3637 = vmatpush3.bf16.msra.mxu1 %v1971_v26  ;;  %3638 = vmatprep.mubr.msk.bf16.mxu1 %vm4448_vm0, %v4447_v7 }
 0x76d   : > { %3648 = vmatprep.subr.bf16.mxu1 %v4447_v7 }
 0x76e   : > { %v4086_v10 = vpop.eup %4085 }
 0x76f   : > { %v1919_v13 = vmul.f32 %v4086_v10, %v4082_v30  ;;  %v4088_v49 = vpop.eup %4087 }
 0x770   : > { %v2128_v50 = vsel %vm1681_vm2, %v4088_v49, 0.0 }
 0x771   : > { %v1921_v22 = vpack.c.bf16 %v1919_v13, %v1919_v13 }
 0x773   : > { %3639 = vmatmul.mubr.msk.bf16.vlgmr.msra.gmra.mrb[36].mxu1 %vm1681_vm2, %v1921_v22 }
 0x774   : > { %3650 = vmatprep.mubr.msk.bf16.mxu1 %vm4448_vm0, %v4447_v7 }
 0x775   : > { %3649 = vmatpush3.bf16.xpose.msra.mxu1 %v2072_v28 }
 0x776   : > { %3660 = vmatprep.subr.bf16.mxu1 %v4447_v7 }
 0x77c   : > { %3651 = vmatmul.mubr.msk.bf16.vlgmr.msra.gmra.mrb[40].mxu1 %vm1586_vm1, %v2017_v29 }
 0x77d   : > { %3661 = vmatpush3.bf16.msra.mxu1 %v5158_v46  ;;  %3662 = vmatprep.mubr.msk.bf16.mxu1 %vm4448_vm0, %v4447_v7 }
 0x77e   : > { %3672 = vmatprep.subr.bf16.mxu1 %v4447_v7 }
 0x83e   : > { %v5226_v39 = vpop.f32.mrb[32].mxu1 }
 0x83f   : > { %v3634_v4 = vpop.f32.mrb[33].mxu1 }
 0x840   : > { %v1966_v20 = vpop.f32.mrb[34].mxu1 }
 0x841   : > { %v3635_v37 = vpop.f32.mrb[35].mxu1 }
 0x846   : > { %v5228_v32 = vpop.f32.mrb[36].mxu1 }
 0x847   : > { %v3814_v14 = vpack.i.bf16 %v5228_v32, %v5226_v39  ;;  %v3640_v41 = vpop.f32.mrb[37].mxu1 }
 0x848   : > { %v2013_v3 = vpop.f32.mrb[38].mxu1 }
 0x849   : > { %v3641_v0 = vpop.f32.mrb[39].mxu1 }
 0x84f   : > { %v2108_v42 = vpop.f32.mrb[40].mxu1 }
 0x850   : > { %v2115_v43 = vmul.f32 0.125, %v2108_v42  ;;  %v3652_v33 = vpop.f32.mrb[41].mxu1 }
 0x851   : > { %v2111_v57 = vpop.f32.mrb[42].mxu1 }
 0x852   : > { %v3653_v34 = vpop.f32.mrb[43].mxu1  ;;  %v2119_v48 = vsel %vm1681_vm2, %v2115_v43, -inf }
 0x853   : > { %2120 = vmax.xlane.f32.xlu0 %v2119_v48 }
 0x857   : > { %2129 = vadd.xlane.f32.xlu0 %v2128_v50 }
 0x86d   : > { %2230 = vrot.lane.b32.xlu0 %v5110_v40, %s4449_s24  ;;  %v2283_v40 = vpop.permute.xlu1 %2282 }
 0x86e   : > { %v2288_v27 = vsel %vm1586_vm1, %v2283_v40, 0  ;;  %v3975_v40 = vld [vmem:[#allocation10 + $0x40] ss:$8 sps:$4 sm:$0xff]  }
 0x8e0   : > { %v2121_v51 = vpop.xlane.xlu0 %2120 }
 0x8e1   : > { %v2123_v36 = vsub.f32 %v2115_v43, %v2121_v51 }
 0x8e3   : > { %v2126_v53 = vmul.f32 1.442695, %v2123_v36 }
 0x8e4   : > { %v2130_v52 = vpop.xlane.xlu0 %2129 }
 0x8e5   : > { %4089 = vpow2.f32 %v2126_v53 }
 0x8e6   : > { %4091 = vrcp.f32 %v2130_v52  ;;  %v3963_v52 = vld [vmem:[#allocation10] ss:$8 sps:$4 sm:$0xff]  }
 0x8e8   : > { %v2231_v16 = vpop.permute.xlu0 %2230 }
 0x8e9   : > { %v2236_v11 = vsel %vm1586_vm1, %v2231_v16, 0  ;;  %v3974_v16 = vld [vmem:[#allocation10 + $0x34] ss:$8 sps:$4 sm:$0xff]  }
 0x8ef   : > { %v4090_v35 = vpop.eup %4089 }
 0x8f0   : > { %v4092_v60 = vpop.eup %4091  ;;  %v2131_v61 = vsel %vm1681_vm2, %v4090_v35, 0.0 }
 0x8f1   : > { %v2136_v1 = vmul.f32 %v4092_v60, %v4088_v49  ;;  %2132 = vadd.xlane.f32.xlu1 %v2131_v61  ;;  %v3968_v60 = vld [vmem:[#allocation10 + $0x14] ss:$8 sps:$4 sm:$0xff]   ;;  %v3971_v61 = vld [vmem:[#allocation10 + $0x24] ss:$8 sps:$4 sm:$0xff]  }
 0x8f3   : > { %v2138_v17 = vpack.c.bf16 %v2136_v1, %v2136_v1  ;;  %v3969_v1 = vld [vmem:[#allocation10 + $0x20] ss:$8 sps:$4 sm:$0xff]  }
 0x8f5   : > { %3657 = vmatmul.mubr.msk.bf16.vlgmr.msra.gmra.mrb[16].mxu0 %vm1681_vm2, %v2138_v17  ;;  %v3972_v17 = vld [vmem:[#allocation10 + $0x30] ss:$8 sps:$4 sm:$0xff]  }
 0x8f6   : > { %3667 = vmatpush3.bf16.xpose.msra.mxu0 %v2236_v11  ;;  %3668 = vmatprep.mubr.msk.bf16.mxu0 %vm4448_vm0, %v4447_v7  ;;  %v3977_v11 = vld [vmem:[#allocation10 + $0x44] ss:$8 sps:$4 sm:$0xff]  }
 0x8f7   : > { %3678 = vmatprep.subr.bf16.mxu0 %v4447_v7 }
 0x902   : > { %2227 = vrot.lane.b32.xlu1 %v5125_v38, %s4449_s24 }
 0x906   : > { %2279 = vrot.lane.b32.xlu1 %v2017_v29, %s4449_s24 }
 0x97e   : > { %v2133_v18 = vpop.xlane.xlu1 %2132 }
 0x97f   : > { %4093 = vrcp.f32 %v2133_v18  ;;  %v3980_v18 = vld [vmem:[#allocation10 + $0x54] ss:$8 sps:$4 sm:$0xff]  }
 0x982   : > { %v2228_v21 = vpop.permute.xlu1 %2227 }
 0x983   : > { %3669 = vmatmul.mubr.msk.bf16.vlgmr.msra.gmra.mrb[20].mxu0 %vm1586_vm1, %v2228_v21  ;;  %v3978_v21 = vld [vmem:[#allocation10 + $0x50] ss:$8 sps:$4 sm:$0xff]  }
 0x984   : > { %3680 = vmatprep.mubr.msk.bf16.mxu0 %vm4448_vm0, %v4447_v7 }
 0x986   : > { %v2280_v38 = vpop.permute.xlu1 %2279 }
 0x989   : > { %v4094_v56 = vpop.eup %4093 }
 0x98a   : > { %v2137_v5 = vmul.f32 %v4094_v56, %v4090_v35  ;;  %v3965_v35 = vld [vmem:[#allocation10 + $0x4] ss:$8 sps:$4 sm:$0xff]  }
 0x98b   : > { %v3983_v56 = vld [vmem:[#allocation10 + $0x64] ss:$8 sps:$4 sm:$0xff]  }
 0x98c   : > { %v2139_v59 = vpack.c.bf16 %v2137_v5, %v2137_v5  ;;  %v3981_v5 = vld [vmem:[#allocation10 + $0x60] ss:$8 sps:$4 sm:$0xff]  }
 0x98e   : > { %3663 = vmatmul.mubr.msk.bf16.vlgmr.msra.gmra.mrb[44].mxu1 %vm1681_vm2, %v2139_v59  ;;  %v3986_v59 = vld [vmem:[#allocation10 + $0x74] ss:$8 sps:$4 sm:$0xff]  }
 0x98f   : > { %3673 = vmatpush3.bf16.xpose.msra.mxu1 %v2288_v27  ;;  %3674 = vmatprep.mubr.msk.bf16.mxu1 %vm4448_vm0, %v4447_v7  ;;  %v3984_v27 = vld [vmem:[#allocation10 + $0x70] ss:$8 sps:$4 sm:$0xff]  }
 0x990   : > { %3684 = vmatprep.subr.bf16.mxu1 %v4447_v7 }
 0x996   : > { %3675 = vmatmul.mubr.msk.bf16.vlgmr.msra.gmra.mrb[48].mxu1 %vm1586_vm1, %v2280_v38  ;;  %v3989_v38 = vld [vmem:[#allocation10 + $0x84] ss:$8 sps:$4 sm:$0xff]  }
 0x997   : > { %3686 = vmatprep.mubr.msk.bf16.mxu1 %vm4448_vm0, %v4447_v7 }
 0x9c8   : > { %v5256_v19 = vpop.f32.mrb[16].mxu0 }
 0x9c9   : > { %v3658_v6 = vpop.f32.mrb[17].mxu0 }
 0x9ca   : > { %v2180_v55 = vpop.f32.mrb[18].mxu0  ;;  %v3987_v6 = vld [vmem:[#allocation10 + $0x80] ss:$8 sps:$4 sm:$0xff]  }
 0x9cb   : > { %v3659_v8 = vpop.f32.mrb[19].mxu0  ;;  %v3992_v55 = vld [vmem:[#allocation10 + $0x94] ss:$8 sps:$4 sm:$0xff]  }
 0x9cc   : > { %v3990_v8 = vld [vmem:[#allocation10 + $0x90] ss:$8 sps:$4 sm:$0xff]  }
 0xa56   : > { %v2272_v30 = vpop.f32.mrb[20].mxu0 }
 0xa57   : > { %v2330_v62 = vmul.f32 0.125, %v2272_v30  ;;  %v3670_v15 = vpop.f32.mrb[21].mxu0  ;;  %v3995_v30 = vld [vmem:[#allocation10 + $0xa4] ss:$8 sps:$4 sm:$0xff]  }
 0xa58   : > { %v2275_v23 = vpop.f32.mrb[22].mxu0  ;;  %v3998_v15 = vld [vmem:[#allocation10 + $0xb4] ss:$8 sps:$4 sm:$0xff]  }
 0xa59   : > { %v3671_v24 = vpop.f32.mrb[23].mxu0  ;;  %v2332_v54 = vsel %vm1681_vm2, %v2330_v62, -inf  ;;  %v3996_v23 = vld [vmem:[#allocation10 + $0xb0] ss:$8 sps:$4 sm:$0xff]  }
 0xa5a   : > { %2333 = vmax.xlane.f32.xlu0 %v2332_v54  ;;  %v4001_v24 = vld [vmem:[#allocation10 + $0xc4] ss:$8 sps:$4 sm:$0xff]   ;;  %v3999_v54 = vld [vmem:[#allocation10 + $0xc0] ss:$8 sps:$4 sm:$0xff]  }
 0xa61   : > { %v5259_v58 = vpop.f32.mrb[44].mxu1 }
 0xa62   : > { %v3664_v9 = vpop.f32.mrb[45].mxu1 }
 0xa63   : > { %v2223_v26 = vpop.f32.mrb[46].mxu1  ;;  %v4004_v9 = vld [vmem:[#allocation10 + $0xd4] ss:$8 sps:$4 sm:$0xff]  }
 0xa64   : > { %v3665_v10 = vpop.f32.mrb[47].mxu1  ;;  %v4002_v26 = vld [vmem:[#allocation10 + $0xd0] ss:$8 sps:$4 sm:$0xff]  }
 0xa65   : > { %v4005_v10 = vld [vmem:[#allocation10 + $0xe0] ss:$8 sps:$4 sm:$0xff]  }
 0xa69   : > { %v2324_v13 = vpop.f32.mrb[48].mxu1 }
 0xa6a   : > { %v2331_v7 = vmul.f32 0.125, %v2324_v13  ;;  %v3676_v22 = vpop.f32.mrb[49].mxu1  ;;  %v4007_v13 = vld [vmem:[#allocation10 + $0xe4] ss:$8 sps:$4 sm:$0xff]  }
 0xa6b   : > { %v2327_v28 = vpop.f32.mrb[50].mxu1 }
 0xa6c   : > { %v3677_v29 = vpop.f32.mrb[51].mxu1  ;;  %v2335_v63 = vsel %vm1681_vm2, %v2331_v7, -inf }
 0xa6d   : > { %2336 = vmax.xlane.f32.xlu1 %v2335_v63  ;;  %v4010_v63 = vld [vmem:[#allocation10 + $0xf4] ss:$8 sps:$4 sm:$0xff]  }
 0xa7e   : > { %2404 = vrot.lane.b32.xlu1 %v5158_v46, %s4449_s24 }
 0xae7   : > { %v2334_v4 = vpop.xlane.xlu0 %2333 }
 0xae8   : > { %v2338_v20 = vsub.f32 %v2330_v62, %v2334_v4  ;;  %v3993_v62 = vld [vmem:[#allocation10 + $0xa0] ss:$8 sps:$4 sm:$0xff]   ;;  %v4008_v4 = vld [vmem:[#allocation10 + $0xf0] ss:$8 sps:$4 sm:$0xff]  }
 0xaea   : > { %v2340_v31 = vmul.f32 1.442695, %v2338_v20  ;;  %v4011_v20 = vld [vmem:[#allocation11 + $0x40] sm:$0xff]  }
 0xaec   : > { %4095 = vpow2.f32 %v2340_v31  ;;  %v4012_v31 = vld [vmem:[#allocation11] sm:$0xff]  }
 0xaf6   : > { %v4096_v37 = vpop.eup %4095 }
 0xaf7   : > { %v2344_v25 = vsel %vm1681_vm2, %v4096_v37, 0.0 }
 0xaf8   : > { %2345 = vadd.xlane.f32.xlu0 %v2344_v25 }
 0xafa   : > { %v2337_v41 = vpop.xlane.xlu1 %2336 }
 0xafb   : > { %v2339_v3 = vsub.f32 %v2331_v7, %v2337_v41 }
 0xafd   : > { %v2342_v0 = vmul.f32 1.442695, %v2339_v3 }
 0xafe   : > { %v2405_v42 = vpop.permute.xlu1 %2404 }
 0xaff   : > { %4097 = vpow2.f32 %v2342_v0  ;;  %3685 = vmatpush3.bf16.msra.mxu1 %v2405_v42  ;;  %v4014_v42 = vld [vmem:[#allocation11 + $0x8] sm:$0xff]  }
 0xb00   : > { %3572 = vmatprep.subr.bf16.mxu1 %v4011_v20 }
 0xb09   : > { %v4098_v43 = vpop.eup %4097 }
 0xb0a   : > { %v2347_v33 = vsel %vm1681_vm2, %v4098_v43, 0.0 }
 0xb0b   : > { %2348 = vadd.xlane.f32.xlu0 %v2347_v33  ;;  %v4015_v33 = vld [vmem:[#allocation11 + $0x50] sm:$0xff]  }
 0xb21   : > { %2357 = vrot.lane.b32.xlu0 %v5150_v12, %s4449_s24  ;;  %v3966_v12 = vld [vmem:[#allocation10 + $0x10] ss:$8 sps:$4 sm:$0xff]  }
 0xb85   : > { %v2346_v46 = vpop.xlane.xlu0 %2345 }
 0xb86   : > { %4099 = vrcp.f32 %v2346_v46  ;;  %v4016_v46 = vld [vmem:[#allocation11 + $0x10] sm:$0xff]  }
 0xb90   : > { %v4100_v57 = vpop.eup %4099 }
 0xb91   : > { %v2352_v48 = vmul.f32 %v4100_v57, %v4096_v37  ;;  %v4013_v37 = vld [vmem:[#allocation11 + $0x48] sm:$0xff]   ;;  %v4017_v57 = vld [vmem:[#allocation11 + $0x58] sm:$0xff]  }
 0xb93   : > { %v2354_v50 = vpack.c.bf16 %v2352_v48, %v2352_v48  ;;  %v4019_v48 = vld [vmem:[#allocation11 + $0x60] sm:$0xff]  }
 0xb98   : > { %v2349_v34 = vpop.xlane.xlu0 %2348 }
 0xb99   : > { %4101 = vrcp.f32 %v2349_v34  ;;  %v4018_v34 = vld [vmem:[#allocation11 + $0x18] sm:$0xff]  }
 0xb9c   : > { %v2358_v49 = vpop.permute.xlu0 %2357 }
 0xb9d   : > { %3679 = vmatpush3.bf16.msra.mxu0 %v2358_v49  ;;  %v4020_v49 = vld [vmem:[#allocation11 + $0x20] sm:$0xff]  }
 0xb9e   : > { %2677 = vmatprep.subr.bf16.mxu0 %v3965_v35 }
 0xba0   : > { %3681 = vmatmul.mubr.msk.bf16.vlgmr.msra.gmra.mrb[24].mxu0 %vm1681_vm2, %v2354_v50  ;;  %v4021_v50 = vld [vmem:[#allocation11 + $0x68] sm:$0xff]  }
 0xba1   : > { %2678 = vmatpush1.bf16.msra.mxu0 %v3963_v52 }
 0xba2   : > { %2679 = vmatprep.subr.bf16.mxu0 %v3968_v60 }
 0xba3   : > { %v4102_v51 = vpop.eup %4101 }
 0xba4   : > { %v2353_v36 = vmul.f32 %v4102_v51, %v4098_v43  ;;  %v4022_v51 = vld [vmem:[#allocation11 + $0x28] sm:$0xff]  }
 0xba5   : > { %2680 = vmatpush1.bf16.msra.mxu0 %v3966_v12 }
 0xba6   : > { %v2355_v53 = vpack.c.bf16 %v2353_v36, %v2353_v36  ;;  %2681 = vmatprep.subr.bf16.mxu0 %v3971_v61 }
 0xba8   : > { %3687 = vmatmul.mubr.msk.bf16.vlgmr.msra.gmra.mrb[52].mxu1 %vm1681_vm2, %v2355_v53 }
 0xba9   : > { %2682 = vmatpush1.bf16.msra.mxu0 %v3969_v1  ;;  %3573 = vmatpush3.bf16.msra.mxu1 %v4012_v31 }
 0xbaa   : > { %2683 = vmatprep.subr.bf16.mxu0 %v3974_v16  ;;  %3574 = vmatprep.subr.bf16.mxu1 %v4013_v37 }
 0xbad   : > { %2684 = vmatpush1.bf16.msra.mxu0 %v3972_v17  ;;  %3575 = vmatpush3.bf16.msra.mxu1 %v4014_v42  ;;  %v4023_v17 = vld [vmem:[#allocation11 + $0x70] sm:$0xff]  }
 0xbae   : > { %2685 = vmatprep.subr.bf16.mxu0 %v3977_v11  ;;  %3576 = vmatprep.subr.bf16.mxu1 %v4015_v33  ;;  %v4024_v11 = vld [vmem:[#allocation11 + $0x30] sm:$0xff]  }
 0xbb1   : > { %2686 = vmatpush1.bf16.msra.mxu0 %v3975_v40  ;;  %3577 = vmatpush3.bf16.msra.mxu1 %v4016_v46  ;;  %v4026_v40 = vld [vmem:[#allocation11 + $0x38] sm:$0xff]  }
 0xbb2   : > { %2687 = vmatprep.subr.bf16.mxu0 %v3980_v18  ;;  %3578 = vmatprep.subr.bf16.mxu1 %v4017_v57  ;;  %v4027_v57 = vld [vmem:[#allocation13] ss:$8 sps:$4 sm:$0xff]  }
 0xbb5   : > { %2688 = vmatpush1.bf16.msra.mxu0 %v3978_v21  ;;  %3579 = vmatpush3.bf16.msra.mxu1 %v4018_v34  ;;  %v4029_v34 = vld [vmem:[#allocation13 + $0x4] ss:$8 sps:$4 sm:$0xff]  }
 0xbb6   : > { %2689 = vmatprep.subr.bf16.mxu0 %v3983_v56  ;;  %3580 = vmatprep.subr.bf16.mxu1 %v4019_v48  ;;  %v4032_v48 = vld [vmem:[#allocation13 + $0x14] ss:$8 sps:$4 sm:$0xff]  }
 0xbb9   : > { %2690 = vmatpush1.bf16.msra.mxu0 %v3981_v5  ;;  %3581 = vmatpush3.bf16.msra.mxu1 %v4020_v49  ;;  %v4030_v49 = vld [vmem:[#allocation13 + $0x10] ss:$8 sps:$4 sm:$0xff]  }
 0xbba   : > { %2691 = vmatprep.subr.bf16.mxu0 %v3986_v59  ;;  %3582 = vmatprep.subr.bf16.mxu1 %v4021_v50 }
 0xbbd   : > { %2692 = vmatpush1.bf16.msra.mxu0 %v3984_v27  ;;  %3583 = vmatpush3.bf16.msra.mxu1 %v4022_v51 }
 0xbbe   : > { %2693 = vmatprep.subr.bf16.mxu0 %v3989_v38  ;;  %3584 = vmatprep.subr.bf16.mxu1 %v4023_v17  ;;  %v4044_v17 = vld [vmem:[#allocation13 + $0x54] ss:$8 sps:$4 sm:$0xff]  }
 0xbc1   : > { %2694 = vmatpush1.bf16.msra.mxu0 %v3987_v6  ;;  %3585 = vmatpush3.bf16.msra.mxu1 %v4024_v11  ;;  %v4042_v11 = vld [vmem:[#allocation13 + $0x50] ss:$8 sps:$4 sm:$0xff]  }
 0xbc2   : > { %2695 = vmatprep.subr.bf16.mxu0 %v3992_v55 }
 0xbc5   : > { %2696 = vmatpush1.bf16.msra.mxu0 %v3990_v8 }
 0xbc6   : > { %2697 = vmatprep.subr.bf16.mxu0 %v3995_v30 }
 0xbc9   : > { %2698 = vmatpush1.bf16.msra.mxu0 %v3993_v62  ;;  %v2754_v62 = vld [vmem:[#allocation14 + $0x4] ss:$0 sm:$0xff] }
 0xbca   : > { %2699 = vmatprep.subr.bf16.mxu0 %v3998_v15 }
 0xbcd   : > { %2700 = vmatpush1.bf16.msra.mxu0 %v3996_v23 }
 0xbce   : > { %2701 = vmatprep.subr.bf16.mxu0 %v4001_v24 }
 0xbd1   : > { %2702 = vmatpush1.bf16.msra.mxu0 %v3999_v54 }
 0xbd2   : > { %2703 = vmatprep.subr.bf16.mxu0 %v4004_v9 }
 0xbd5   : > { %2704 = vmatpush1.bf16.msra.mxu0 %v4002_v26 }
 0xbd6   : > { %2705 = vmatprep.subr.bf16.mxu0 %v4007_v13 }
 0xbd9   : > { %2706 = vmatpush1.bf16.msra.mxu0 %v4005_v10 }
 0xbda   : > { %2707 = vmatprep.subr.bf16.mxu0 %v4010_v63 }
 0xbdd   : > { %2708 = vmatpush1.bf16.msra.mxu0 %v4008_v4 }
 0xc73   : > { %v2397_v7 = vpop.f32.mrb[24].mxu0 }
 0xc74   : > { %v3682_v22 = vpop.f32.mrb[25].mxu0 }
 0xc75   : > { %v2400_v28 = vpop.f32.mrb[26].mxu0 }
 0xc76   : > { %v3683_v29 = vpop.f32.mrb[27].mxu0 }
 0xc7b   : > { %v2444_v25 = vpop.f32.mrb[52].mxu1 }
 0xc7c   : > { %v3809_v41 = vpack.i.bf16 %v2444_v25, %v2397_v7  ;;  %v3688_v3 = vpop.f32.mrb[53].mxu1 }
 0xc7d   : > { %v2447_v0 = vpop.f32.mrb[54].mxu1 }
 0xc7e   : > { %3810 = vrot.lane.b32.xlu1 %v3809_v41, %s4449_s24  ;;  %v3689_v43 = vpop.f32.mrb[55].mxu1 }
 0xc82   : > { %3815 = vrot.lane.b32.xlu1 %v3814_v14, %s4449_s24 }
 0xcf0   : > { %v3811_v36 = vpop.permute.xlu1 %3810 }
 0xcf1   : > { %v3813_v53 = vunpack.i.h.bf16 %v3811_v36  ;;  %v3812_v52 = vunpack.i.l.bf16 %v3811_v36 }
 0xcf3   : > { %v2468_v39 = vsel %vm1586_vm1, %v5256_v19, %v3812_v52  ;;  %v2469_v32 = vsel %vm1586_vm1, %v5259_v58, %v3813_v53  ;;  %v4025_v19 = vld [vmem:[#allocation11 + $0x78] sm:$0xff]   ;;  %v2505_v58 = vld [vmem:[#allocation14 + $0x3] ss:$8 sm:$0x3] }
 0xcf4   : > { %v3816_v14 = vpop.permute.xlu1 %3815  ;;  %v2471_v35 = vpack.c.bf16 %v2469_v32, %v2468_v39  ;;  %3586 = vmatprep.subr.bf16.mxu1 %v4025_v19  ;;  %v2514_v21 = vrot.slane %v2505_v58, %v4995_v45  ;;  %v2510_v56 = vrot.slane %v2505_v58, %v4993_v44  ;;  %v4045_v19 = vld [vmem:[#allocation13 + $0x60] ss:$8 sps:$4 sm:$0xff]   ;;  %v4050_v58 = vld [vmem:[#allocation13 + $0x74] ss:$8 sps:$4 sm:$0xff]  }
 0xcf5   : > { %v3818_v60 = vunpack.i.h.bf16 %v3816_v14  ;;  %v3817_v12 = vunpack.i.l.bf16 %v3816_v14  ;;  %3587 = vmatpush3.bf16.msra.mxu1 %v4026_v40  ;;  %v4047_v40 = vld [vmem:[#allocation13 + $0x64] ss:$8 sps:$4 sm:$0xff]  }
 0xcf6   : > { %2709 = vmatprep.mubr.bf16.mxu0 %v2471_v35  ;;  %3049 = vmatprep.subr.bf16.mxu1 %v4029_v34  ;;  %v4035_v35 = vld [vmem:[#allocation13 + $0x24] ss:$8 sps:$4 sm:$0xff]  }
 0xcf7   : > { %v2467_v61 = vsel %vm1586_vm1, %v5194_v47, %v3818_v60  ;;  %v2466_v1 = vsel %vm1586_vm1, %v5192_v2, %v3817_v12  ;;  %v4033_v60 = vld [vmem:[#allocation13 + $0x20] ss:$8 sps:$4 sm:$0xff]   ;;  %v4038_v12 = vld [vmem:[#allocation13 + $0x34] ss:$8 sps:$4 sm:$0xff]  }
 0xcf8   : > { %v2470_v16 = vpack.c.bf16 %v2467_v61, %v2466_v1  ;;  %v4036_v61 = vld [vmem:[#allocation13 + $0x30] ss:$8 sps:$4 sm:$0xff]   ;;  %v4041_v1 = vld [vmem:[#allocation13 + $0x44] ss:$8 sps:$4 sm:$0xff]  }
 0xcfa   : > { %2710 = vmatmul.mubr.bf16.vlgmr.msra.gmra.mrb[28].mxu0 %v2470_v16  ;;  %v4039_v16 = vld [vmem:[#allocation13 + $0x40] ss:$8 sps:$4 sm:$0xff]  }
 0xdcd   : > { %v2711_v18 = vpop.f32.mrb[28].mxu0 }
 0xdce   : > { %v2713_v47 = vpop.f32.mrb[29].mxu0  ;;  %v5291_v6 = vadd.f32 %v2711_v18, %v2510_v56  ;;  %v4450_v18 = vmov 0  }
 0xdcf   : > { %v2715_v5 = vpop.f32.mrb[30].mxu0  ;;  %v5287_v27 = vadd.f32 %v2713_v47, %v2514_v21 }
 0xdd0   : > { %v5285_v59 = vadd.f32 %v2715_v5, %v2510_v56  ;;  %v2717_v2 = vpop.f32.mrb[31].mxu0 }
 0xdd1   : > { %v5289_v38 = vadd.f32 %v2717_v2, %v2514_v21  ;;  %v4048_v21 = vld [vmem:[#allocation13 + $0x70] ss:$8 sps:$4 sm:$0xff]  }
 0xdd2   : > { %v2720_v8 = vpack.c.bf16 %v5285_v59, %v5291_v6 }
 0xdd3   : > { %v2721_v55 = vpack.c.bf16 %v5289_v38, %v5287_v27 }
 0xdd5   : > { %2883 = vmatprep.mubr.bf16.mxu1 %v2721_v55 }
 0xdd6   : > { %2884 = vmatmul.mubr.bf16.vlgmr.msra.gmra.mrb[56].mxu1 %v2720_v8 }
 0xdd7   : > { %3050 = vmatpush1.bf16.msra.mxu1 %v4027_v57  ;;  %3081 = vmatprep.mubr.bf16.mxu1 %v4450_v18 }
 0xdd8   : > { %3051 = vmatprep.subr.bf16.mxu1 %v4032_v48 }
 0xddb   : > { %3052 = vmatpush1.bf16.msra.mxu1 %v4030_v49 }
 0xddc   : > { %3053 = vmatprep.subr.bf16.mxu1 %v4035_v35 }
 0xddf   : > { %3054 = vmatpush1.bf16.msra.mxu1 %v4033_v60 }
 0xde0   : > { %3055 = vmatprep.subr.bf16.mxu1 %v4038_v12 }
 0xde3   : > { %3056 = vmatpush1.bf16.msra.mxu1 %v4036_v61 }
 0xde4   : > { %3057 = vmatprep.subr.bf16.mxu1 %v4041_v1 }
 0xde7   : > { %3058 = vmatpush1.bf16.msra.mxu1 %v4039_v16 }
 0xde8   : > { %3059 = vmatprep.subr.bf16.mxu1 %v4044_v17 }
 0xdeb   : > { %3060 = vmatpush1.bf16.msra.mxu1 %v4042_v11 }
 0xdec   : > { %3061 = vmatprep.subr.bf16.mxu1 %v4047_v40 }
 0xdef   : > { %3062 = vmatpush1.bf16.msra.mxu1 %v4045_v19 }
 0xdf0   : > { %3063 = vmatprep.subr.bf16.mxu1 %v4050_v58 }
 0xdf3   : > { %3064 = vmatpush1.bf16.msra.mxu1 %v4048_v21 }
 0xea9   : > { %v3588_v30 = vpop.f32.mrb[56].mxu1 }
 0xeaa   : > { %v3589_v15 = vpop.f32.mrb[57].mxu1 }
 0xeab   : > { %v3590_v23 = vadd.f32 %v3589_v15, %v3588_v30  ;;  %v3591_v24 = vpop.f32.mrb[58].mxu1  ;;  %v2910_v15 = vld [vmem:[%s5452_s9 + $0x6] ss:$0 sm:$0xff] }
 0xeac   : > { %v3592_v54 = vpop.f32.mrb[59].mxu1 }
 0xead   : > { %v2886_v9 = vadd.f32 %v3590_v23, %v2754_v62  ;;  %v3593_v26 = vadd.f32 %v3592_v54, %v3591_v24 }
 0xeaf   : > { %v2889_v10 = vadd.f32 %v3593_v26, %v2754_v62  ;;  %v2894_v13 = vmul.f32 0.044715, %v2886_v9  ;;  %v2892_v41 = vmul.f32 0.5, %v2886_v9 }
 0xeb1   : > { %v2896_v7 = vmul.f32 %v2894_v13, %v2886_v9  ;;  %v2895_v22 = vmul.f32 0.044715, %v2889_v10  ;;  %v2893_v43 = vmul.f32 0.5, %v2889_v10 }
 0xeb3   : > { %v2898_v28 = vmul.f32 %v2896_v7, %v2886_v9  ;;  %v2897_v29 = vmul.f32 %v2895_v22, %v2889_v10  ;;  %v2957_v22 = vld [vmem:[#allocation14 + $0x5] ss:$8 sm:$0x3] }
 0xeb5   : > { %v2900_v63 = vadd.f32 %v2898_v28, %v2886_v9  ;;  %v2899_v4 = vmul.f32 %v2897_v29, %v2889_v10  ;;  %v2911_v9 = vld [vmem:[%s5452_s9 + $0x7] ss:$0 sm:$0xff]  ;;  %v2962_v28 = vrot.slane %v2957_v22, %v4993_v44  ;;  %v2966_v29 = vrot.slane %v2957_v22, %v4995_v45 }
 0xeb7   : > { %v2902_v20 = vmul.f32 0.7978846, %v2900_v63  ;;  %v2901_v31 = vadd.f32 %v2899_v4, %v2889_v10 }
 0xeb9   : > { %4103 = vtanh.f32 %v2902_v20  ;;  %v2903_v37 = vmul.f32 0.7978846, %v2901_v31 }
 0xebb   : > { %4105 = vtanh.f32 %v2903_v37 }
 0xec3   : > { %v4104_v25 = vpop.eup %4103 }
 0xec4   : > { %v2906_v3 = vadd.f32 1.0, %v4104_v25 }
 0xec5   : > { %v4106_v0 = vpop.eup %4105 }
 0xec6   : > { %v2908_v42 = vmul.f32 %v2906_v3, %v2892_v41  ;;  %v2907_v33 = vadd.f32 1.0, %v4106_v0 }
 0xec8   : > { %2912 = vadd.xlane.f32.xlu0 %v2908_v42  ;;  %v2909_v46 = vmul.f32 %v2907_v33, %v2893_v43 }
 0xeca   : > { %2914 = vadd.xlane.f32.xlu1 %v2909_v46 }
 0xf55   : > { %v2913_v50 = vpop.xlane.xlu0 %2912 }
 0xf56   : > { %v2917_v51 = vmul.f32 0.0078125, %v2913_v50 }
 0xf57   : > { %v2915_v36 = vpop.xlane.xlu1 %2914 }
 0xf58   : > { %v2919_v53 = vsub.f32 %v2908_v42, %v2917_v51  ;;  %v2918_v52 = vmul.f32 0.0078125, %v2915_v36 }
 0xf5a   : > { %v2920_v39 = vsub.f32 %v2909_v46, %v2918_v52  ;;  %v2921_v32 = vmul.f32 %v2919_v53, %v2919_v53 }
 0xf5c   : > { %2923 = vadd.xlane.f32.xlu0 %v2921_v32  ;;  %v2922_v14 = vmul.f32 %v2920_v39, %v2920_v39 }
 0xf60   : > { %2925 = vadd.xlane.f32.xlu0 %v2922_v14 }
 0xfe9   : > { %v2924_v56 = vpop.xlane.xlu0 %2923 }
 0xfea   : > { %v2927_v47 = vmul.f32 0.0078125, %v2924_v56 }
 0xfec   : > { %v2929_v5 = vadd.f32 1e-05, %v2927_v47 }
 0xfed   : > { %v2926_v2 = vpop.xlane.xlu0 %2925 }
 0xfee   : > { %4107 = vrsqrt.f32 %v2929_v5  ;;  %v2928_v55 = vmul.f32 0.0078125, %v2926_v2 }
 0xff0   : > { %v2930_v8 = vadd.f32 1e-05, %v2928_v55 }
 0xff2   : > { %4109 = vrsqrt.f32 %v2930_v8 }
 0xff8   : > { %v4108_v30 = vpop.eup %4107 }
 0xff9   : > { %v2933_v62 = vmul.f32 %v4108_v30, %v2919_v53 }
 0xffb   : > { %v2935_v54 = vmul.f32 %v2933_v62, %v2910_v15 }
 0xffc   : > { %v4110_v23 = vpop.eup %4109 }
 0xffd   : > { %v2934_v24 = vmul.f32 %v4110_v23, %v2920_v39  ;;  %v2937_v10 = vadd.f32 %v2935_v54, %v2911_v9 }
 0xfff   : > { %v2936_v26 = vmul.f32 %v2934_v24, %v2910_v15 }
0x1001   : > { %v2938_v13 = vadd.f32 %v2936_v26, %v2911_v9 }
0x1003   : > { %v2939_v7 = vpack.c.bf16 %v2938_v13, %v2937_v10 }
0x1005   : > { %3082 = vmatmul.mubr.bf16.vlgmr.msra.gmra.mrb[60].mxu1 %v2939_v7 }
0x10d8   : > { %v3083_v63 = vpop.f32.mrb[60].mxu1 }
0x10d9   : > { %v3084_v4 = vadd.f32 %v3083_v63, %v2962_v28  ;;  %v3085_v20 = vpop.f32.mrb[61].mxu1 }
0x10da   : > { %v3086_v31 = vadd.f32 %v3085_v20, %v2966_v29  ;;  %v3087_v37 = vpop.f32.mrb[62].mxu1 }
0x10db   : > { %v3096_v25 = vmul.f32 0.044715, %v3084_v4  ;;  %v3088_v41 = vadd.f32 %v3087_v37, %v2962_v28  ;;  %v3089_v3 = vpop.f32.mrb[63].mxu1  ;;  %v3092_v61 = vmul.f32 0.5, %v3084_v4 }
0x10dc   : > { %v3097_v0 = vmul.f32 0.044715, %v3086_v31  ;;  %v3090_v42 = vadd.f32 %v3089_v3, %v2966_v29  ;;  %v3093_v17 = vmul.f32 0.5, %v3086_v31 }
0x10dd   : > { %v3100_v43 = vmul.f32 %v3096_v25, %v3084_v4  ;;  %v3098_v33 = vmul.f32 0.044715, %v3088_v41  ;;  %v3094_v58 = vmul.f32 0.5, %v3088_v41 }
0x10de   : > { %v3101_v46 = vmul.f32 %v3097_v0, %v3086_v31  ;;  %v3099_v57 = vmul.f32 0.044715, %v3090_v42  ;;  %v3095_v56 = vmul.f32 0.5, %v3090_v42 }
0x10df   : > { %v3104_v34 = vmul.f32 %v3100_v43, %v3084_v4  ;;  %v3102_v48 = vmul.f32 %v3098_v33, %v3088_v41 }
0x10e0   : > { %v3105_v49 = vmul.f32 %v3101_v46, %v3086_v31  ;;  %v3103_v44 = vmul.f32 %v3099_v57, %v3090_v42 }
0x10e1   : > { %v3108_v50 = vadd.f32 %v3104_v34, %v3084_v4  ;;  %v3106_v45 = vmul.f32 %v3102_v48, %v3088_v41 }
0x10e2   : > { %v3109_v51 = vadd.f32 %v3105_v49, %v3086_v31  ;;  %v3107_v36 = vmul.f32 %v3103_v44, %v3090_v42 }
0x10e3   : > { %v3112_v53 = vmul.f32 0.7978846, %v3108_v50  ;;  %v3110_v52 = vadd.f32 %v3106_v45, %v3088_v41 }
0x10e4   : > { %v3113_v39 = vmul.f32 0.7978846, %v3109_v51  ;;  %v3111_v32 = vadd.f32 %v3107_v36, %v3090_v42 }
0x10e5   : > { %4111 = vtanh.f32 %v3112_v53  ;;  %v3114_v14 = vmul.f32 0.7978846, %v3110_v52 }
0x10e6   : > { %4113 = vtanh.f32 %v3113_v39  ;;  %v3115_v35 = vmul.f32 0.7978846, %v3111_v32 }
0x10e7   : > { %4115 = vtanh.f32 %v3114_v14 }
0x10e8   : > { %4117 = vtanh.f32 %v3115_v35 }
0x10ef   : > { %v4112_v60 = vpop.eup %4111 }
0x10f0   : > { %v4114_v12 = vpop.eup %4113  ;;  %v3120_v1 = vadd.f32 1.0, %v4112_v60 }
0x10f1   : > { %v4116_v16 = vpop.eup %4115  ;;  %v3121_v11 = vadd.f32 1.0, %v4114_v12 }
0x10f2   : > { %v4118_v19 = vpop.eup %4117  ;;  %v3124_v40 = vmul.f32 %v3120_v1, %v3092_v61  ;;  %v3122_v18 = vadd.f32 1.0, %v4116_v16 }
0x10f3   : > { %v3125_v21 = vmul.f32 %v3121_v11, %v3093_v17  ;;  %v3123_v47 = vadd.f32 1.0, %v4118_v19 }
0x10f4   : > { %v3128_v5 = vadd.f32 %v3124_v40, %v5291_v6  ;;  %v3126_v2 = vmul.f32 %v3122_v18, %v3094_v58 }
0x10f5   : > { %v3129_v55 = vadd.f32 %v3125_v21, %v5287_v27  ;;  %v3127_v8 = vmul.f32 %v3123_v47, %v3095_v56 }
0x10f6   : > { %3132 = vst [vmem:[%s501_s7] sm:$0xff] %v3128_v5  ;;  %v3130_v30 = vadd.f32 %v3126_v2, %v5285_v59 }
0x10f7   : > { %3133 = vst [vmem:[%s501_s7 + $0x8] sm:$0xff] %v3129_v55  ;;  %v3131_v6 = vadd.f32 %v3127_v8, %v5289_v38 }
0x10f8   : > { %3134 = vst [vmem:[%s501_s7 + $0x10] sm:$0xff] %v3130_v30 }
0x10f9   : > { %3135 = vst [vmem:[%s501_s7 + $0x18] sm:$0xff] %v3131_v6 }
0x10fa   : > { %4362 = shalt.err (!%p4359_p0)
}
0x10fb   : > { %s4363_s17 = scalar_lea.hbm %s5314_s5, 512  ;;  %s4367_s18 = scalar_lea.hbm %s5454_s19, 1024 }
0x10fc   : > { %p4364_p12 = scmp.ne.s32.totalorder %s5314_s5, %s4363_s17  ;;  %p4368_p6 = scmp.lt.u32.totalorder %s5314_s5, %s5454_s19 }
0x10fd   : > { %p4369_p8 = scmp.lt.u32.totalorder %s4367_s18, %s4363_s17  ;;  %p4371_p2 = scmp.lt.u32.totalorder %s4363_s17, %s5314_s5 }
0x10fe   : > { %p4365_p11 = pnand %p4364_p12, %p5455_p9 }
0x10ff   : > { %p4370_p7 = por %p4369_p8, %p4368_p6 }
0x1100   : > { %p4366_p13 = pneg %p4365_p11 }
0x1101   : > { %p4372_p3 = por %p4371_p2, %p4370_p7 }
0x1103   : > { %p4373_p10 = pnand %p4372_p3, %p4366_p13 }
0x1105   : > { %4376 = shalt.err (!%p4373_p10)
}
0x1106   : > { %s4452_s21 = smov 256   ;;  %s4453_s16 = smov 16  }
0x1107   : > { %3716 = dma.vmem_to_hbm [thread:$0]  (%p5455_p9), %s5316_s30, 512, %s5314_s5, %s3137_s29, %s4452_s21, %s4452_s21, %s4453_s16  }
0x1108 PF: > { %s5456_s23 = sld [smem:[#allocation23_spill]]  ;;  %s5457_s26 = sld [smem:[#allocation30_spill]] }
0x1109   : > { %p5459_p5 = scmp.ge.s32.totalorder %s4431_s12, 2 }
0x110e   : > { %s3166_s7 = sand.u32 1, %s5456_s23   ;;  %p5458_p1 = scmp.ne.s32.totalorder %s5457_s26, 0 }
0x110f   : > { %s3167_s25 = scalar_lea.sflag [#allocation4], %s3166_s7 }
0x1110   : > { %p3745_p4 = pnand %p5459_p5, %p5458_p1 }
0x1112   : > { %4414 = dma.done.wait (!%p3745_p4), %s3167_s25, 512  }
0x1113   : > { %4416 = vsyncadd (!%p3745_p4), %s3167_s25, 4294966784  ;;  %s5460_s12 = sld [smem:[#allocation26_spill]]  ;;  %s5461_s20 = sld [smem:[#allocation24_spill]] }
0x1114   : > { %s5462_s11 = sld [smem:[#allocation28_spill]]  ;;  %s5463_s30 = smov %s4423_s10 }
0x1119   : > { %p28_p0 = scmp.ge.s32.totalorder %s5460_s12, 4   ;;  %s5464_s10 = smov %s5461_s20 }
0x111b   :  { %30 = sbr.rel (!%p28_p0) target bundleno = 16 (0x10), region = 156 }
0x1122   :  { %3172 = vsyncpa [#allocation3], 1 }
0x1123   :  { %3174 = vsyncpa [#allocation3 + $0x1], 1 }
0x1124   :  { %3175 = vsyncpa [#allocation6], 1 }
0x1125   :  { %3177 = vsyncpa [#allocation6 + $0x1], 1 }
0x1126   :  { %3178 = vsyncpa [#allocation9], 1 }
0x1127   :  { %3179 = vsyncpa [#allocation12], 1 }
0x1128   :  { %3180 = vsyncpa [#allocation15], 1 }
0x1129   :  { %3181 = vsyncpa [#allocation4], 1 }
0x112a   :  { %3183 = vsyncpa [#allocation4 + $0x1], 1 }

</bundles_post_ra>
